<compile_context>
chip_gen: v7x
topology: tpu7x:2x2x1
jax: 0.10.0
libtpu: 0.0.40
codegen_flags: <defaults>
</compile_context>

<pallas_src>
import math

import jax
import jax.numpy as jnp
from jax import lax
from jax.experimental import pallas as pl
from jax.experimental.pallas import tpu as pltpu

# ---------------- config (small, consistent with BertForPreTraining) ----------------
B, S = 2, 8            # batch, sequence
H, NH, DH = 32, 2, 16  # hidden, heads, head_dim
I = 64                 # intermediate (FFN)
V = 128                # vocab size
L = 2                  # encoder layers
TYPE_VOCAB, MAX_POS = 2, 16
LN_EPS = 1e-12
MASK_BIAS = -10000.0   # classic BERT extended-attention-mask value
BS = B * S
OUT_W = 128            # lane-dense packed output row: [loss | wc(BS) | nc(B) | pad]

f32 = jnp.float32
bf16 = jnp.bfloat16


# ---------------------------------- kernel helpers ----------------------------------
def _layernorm(h, g, b):
    mu = jnp.mean(h, axis=-1, keepdims=True)
    var = jnp.mean((h - mu) ** 2, axis=-1, keepdims=True)
    return (h - mu) * lax.rsqrt(var + LN_EPS) * g + b


def _gelu(y):
    return 0.5 * y * (1.0 + jnp.tanh(0.7978845608028654 * (y + 0.044715 * y * y * y)))


def _mm(a_bf, w_bf):
    # operands are ALREADY bf16 (single-cast discipline); f32 MXU accumulation
    return jnp.dot(a_bf, w_bf, preferred_element_type=jnp.float32)


# ---------------------------------- fused Pallas kernel ----------------------------------
def _fused_bert_kernel(
    ids_row_ref, ids_col_ref, seg_col_ref, labels_ref, maskf_ref, next_ref,
    word_emb_ref, type_emb_ref, pos_ref, emb_ln_g_ref, emb_ln_b_ref,
    wqkv_ref, bqkv_ref, wo_ref, bo_ref, ln1_g_ref, ln1_b_ref,
    w1_ref, b1_ref, w2_ref, b2_ref, ln2_g_ref, ln2_b_ref,
    mlm_w_ref, mlm_b_ref, mlm_ln_g_ref, mlm_ln_b_ref,
    dec_wt_ref, dec_b_ref, pool_w_ref, pool_b_ref, nsp_w_ref, nsp_b_ref,
    out_ref,
):
    # --- embeddings gathered in-kernel: one-hot MXU gather + 2-way type select + pos add ---
    onehot = (lax.broadcasted_iota(jnp.int32, (BS, V), 1) == ids_col_ref[...]).astype(bf16)
    word = _mm(onehot, word_emb_ref[...])                                    # (BS, H) f32
    te = type_emb_ref[...]                                                   # (TYPE_VOCAB=2, H)
    type_c = jnp.where(seg_col_ref[...] == 1, te[1:2, :], te[0:1, :])        # (BS, H)
    x = _layernorm(word + type_c + pos_ref[...], emb_ln_g_ref[...], emb_ln_b_ref[...])
    x_bf = x.astype(bf16)                                                    # bf16 shadow copy

    # --- attention-mask bias built once from input_ids, broadcast over heads: (NH*B, 1, S) ---
    maskbias = jnp.where(ids_row_ref[...] == 0, MASK_BIAS, 0.0)              # (B, S) f32
    bias_n = jnp.broadcast_to(maskbias[None, :, None, :], (NH, B, 1, S)).reshape(NH * B, 1, S)

    # --- encoder layers (fully unrolled; activations stay resident in VMEM/vregs) ---
    for l in range(L):
        # fused QKV projection; 1/sqrt(DH) already folded into the Q columns/bias
        qkv = _mm(x_bf, wqkv_ref[l]) + bqkv_ref[l]                           # (BS, 3H) f32

        def _split(off):
            # (BS, H) column block -> (NH*B, S, DH), batch index n = h*B + b.
            # Only 32->DH lane slices + leading-dim reshapes/concats (cheap & safe to lower).
            heads = [qkv[:, off + h * DH: off + (h + 1) * DH].reshape(B, S, DH)
                     for h in range(NH)]
            return jnp.concatenate(heads, axis=0).astype(bf16)

        q = _split(0)
        k = _split(H)
        v = _split(2 * H)

        # all heads in ONE batched einsum pair (scores + PV)
        s = jnp.einsum("nqd,nkd->nqk", q, k,
                       preferred_element_type=jnp.float32) + bias_n          # (NH*B, S, S)
        s = s - jnp.max(s, axis=-1, keepdims=True)
        p = jnp.exp(s)
        ctx = jnp.einsum("nqk,nkd->nqd", p.astype(bf16), v,
                         preferred_element_type=jnp.float32)                 # (NH*B, S, DH)
        # normalize after PV (touches S*DH instead of S*S), EUP approx reciprocal
        ctx = ctx * pl.reciprocal(jnp.sum(p, axis=-1, keepdims=True), approx=True)

        # head merge back to (BS, H), then ONE output projection with K = H
        ctx = jnp.concatenate([ctx[h * B:(h + 1) * B].reshape(BS, DH) for h in range(NH)],
                              axis=1)                                        # (BS, H) f32
        attn_out = _mm(ctx.astype(bf16), wo_ref[l]) + bo_ref[l]

        x = _layernorm(attn_out + x, ln1_g_ref[l], ln1_b_ref[l])
        x_bf = x.astype(bf16)

        ff = _gelu(_mm(x_bf, w1_ref[l]) + b1_ref[l]).astype(bf16)
        ff_out = _mm(ff, w2_ref[l]) + b2_ref[l]
        x = _layernorm(ff_out + x, ln2_g_ref[l], ln2_b_ref[l])
        x_bf = x.astype(bf16)

    # --- MLM head: transform + LN + tied decoder; logits never leave VMEM ---
    t = _gelu(_mm(x_bf, mlm_w_ref[...]) + mlm_b_ref[...])
    t_bf = _layernorm(t, mlm_ln_g_ref[...], mlm_ln_b_ref[...]).astype(bf16)
    logits = _mm(t_bf, dec_wt_ref[...]) + dec_b_ref[...]                     # (BS, V) f32

    # --- masked-LM loss + per-token correctness ---
    labels = labels_ref[...]                                                 # (BS, 1) i32
    maskf = maskf_ref[...]                                                   # (BS, 1) f32
    iota = lax.broadcasted_iota(jnp.int32, (BS, V), 1)
    mx = jnp.max(logits, axis=-1, keepdims=True)
    arg = jnp.min(jnp.where(logits == mx, iota, V), axis=-1, keepdims=True)  # first-occurrence argmax
    wc_col = (arg == labels).astype(jnp.float32)                             # (BS, 1)
    lse = jnp.log(jnp.sum(jnp.exp(logits - mx), axis=-1, keepdims=True)) + mx
    picked = jnp.sum(jnp.where(iota == labels, logits, 0.0), axis=-1, keepdims=True)
    nll = lse - picked                                                       # (BS, 1)
    masked_lm_loss = jnp.sum(nll * maskf) / jnp.maximum(jnp.sum(maskf), 1.0)

    # --- pooler (static first-token slice) + NSP head + NSP loss ---
    first_bf = x.reshape(B, S, H)[:, 0:1, :].reshape(B, H).astype(bf16)      # (B, H)
    pooled = jnp.tanh(_mm(first_bf, pool_w_ref[...]) + pool_b_ref[...])
    nsp = _mm(pooled.astype(bf16), nsp_w_ref[...]) + nsp_b_ref[...]          # (B, 2)

    nlab = next_ref[...]                                                     # (B, 1) i32
    iota2 = lax.broadcasted_iota(jnp.int32, (B, 2), 1)
    mx2 = jnp.max(nsp, axis=-1, keepdims=True)
    arg2 = jnp.min(jnp.where(nsp == mx2, iota2, 2), axis=-1, keepdims=True)
    nc_col = (arg2 == nlab).astype(jnp.float32)                              # (B, 1)
    lse2 = jnp.log(jnp.sum(jnp.exp(nsp - mx2), axis=-1, keepdims=True)) + mx2
    picked2 = jnp.sum(jnp.where(iota2 == nlab, nsp, 0.0), axis=-1, keepdims=True)
    next_sentence_loss = jnp.mean(lse2 - picked2)

    total_loss = masked_lm_loss + next_sentence_loss

    # --- pack everything lane-dense into ONE (1, OUT_W) row: single unmasked store / DMA ---
    lane_bs = lax.broadcasted_iota(jnp.int32, (BS, OUT_W), 1)
    row_bs = lax.broadcasted_iota(jnp.int32, (BS, OUT_W), 0)
    wc_part = jnp.sum(jnp.where(lane_bs == row_bs + 1, wc_col, 0.0), axis=0, keepdims=True)
    lane_b = lax.broadcasted_iota(jnp.int32, (B, OUT_W), 1)
    row_b = lax.broadcasted_iota(jnp.int32, (B, OUT_W), 0)
    nc_part = jnp.sum(jnp.where(lane_b == row_b + 1 + BS, nc_col, 0.0), axis=0, keepdims=True)
    lane_1 = lax.broadcasted_iota(jnp.int32, (1, OUT_W), 1)
    loss_part = jnp.where(lane_1 == 0, total_loss, 0.0)
    out_ref[...] = loss_part + wc_part + nc_part


def fused_bert_forward(prep, input_ids, segment_ids, output_ids, is_masked, is_next_sentence):
    # tiny host-side layout prep (a few hundred bytes; no activation-sized HBM round trips)
    ids_row = input_ids.astype(jnp.int32)
    ids_col = input_ids.reshape(BS, 1).astype(jnp.int32)
    seg_col = segment_ids.reshape(BS, 1).astype(jnp.int32)
    labels_col = output_ids.reshape(BS, 1).astype(jnp.int32)
    maskf_col = is_masked.reshape(BS, 1).astype(jnp.float32)
    next_col = is_next_sentence.reshape(B, 1).astype(jnp.int32)

    args = (ids_row, ids_col, seg_col, labels_col, maskf_col, next_col,
            prep["word_emb_bf"], prep["type_emb"], prep["pos_tiled"],
            prep["emb_ln_g"], prep["emb_ln_b"],
            prep["wqkv"], prep["bqkv"], prep["wo"], prep["bo"], prep["ln1_g"], prep["ln1_b"],
            prep["w1"], prep["b1"], prep["w2"], prep["b2"], prep["ln2_g"], prep["ln2_b"],
            prep["mlm_w"], prep["mlm_b"], prep["mlm_ln_g"], prep["mlm_ln_b"],
            prep["dec_wt"], prep["dec_b"],
            prep["pool_w"], prep["pool_b"], prep["nsp_w"], prep["nsp_b"])

    # advisory cost estimate for the XLA scheduler
    flops = 2 * BS * V * H                                                    # one-hot gather
    flops += L * (2 * BS * H * 3 * H + 2 * (NH * B) * S * S * DH * 2
                  + 2 * BS * H * H + 2 * 2 * BS * H * I)                      # encoder layers
    flops += 2 * BS * H * H + 2 * BS * H * V + 2 * B * H * H + 2 * B * H * 2  # heads
    transcendentals = L * (NH * B * S * S + BS * I) + BS * H + BS * V + B * H + B * 2
    bytes_accessed = sum(int(a.size) * a.dtype.itemsize for a in args) + OUT_W * 4

    # TODO(synk): at real BERT sizes add a "parallel" grid axis (v7x 2 TCs), stream layer
    # weights over an "arbitrary" L axis, and tile the tied decoder over V.
    return pl.pallas_call(
        _fused_bert_kernel,
        out_shape=jax.ShapeDtypeStruct((1, OUT_W), jnp.float32),
        in_specs=[pl.BlockSpec(memory_space=pltpu.MemorySpace.VMEM)] * len(args),
        out_specs=pl.BlockSpec(memory_space=pltpu.MemorySpace.VMEM),
        cost_estimate=pl.CostEstimate(flops=flops, transcendentals=transcendentals,
                                      bytes_accessed=bytes_accessed),
    )(*args)


# ---------------------------------- params ----------------------------------
def init_params(key):
    keys = list(jax.random.split(key, 64))
    ki = iter(keys)

    def dense(shape):
        return 0.02 * jax.random.normal(next(ki), shape, f32)

    def zeros(n):
        return jnp.zeros((n,), f32)

    def ones(n):
        return jnp.ones((n,), f32)

    params = {
        "word_emb": dense((V, H)),
        "pos_emb": dense((MAX_POS, H)),
        "type_emb": dense((TYPE_VOCAB, H)),
        "emb_ln_g": ones(H), "emb_ln_b": zeros(H),
        "layers": [],
        "mlm_w": dense((H, H)), "mlm_b": zeros(H),
        "mlm_ln_g": ones(H), "mlm_ln_b": zeros(H),
        "decoder_b": zeros(V),                 # decoder weight tied to word_emb
        "pool_w": dense((H, H)), "pool_b": zeros(H),
        "nsp_w": dense((H, 2)), "nsp_b": zeros(2),
    }
    for _ in range(L):
        params["layers"].append({
            "wq": dense((H, H)), "bq": zeros(H),
            "wk": dense((H, H)), "bk": zeros(H),
            "wv": dense((H, H)), "bv": zeros(H),
            "wo": dense((H, H)), "bo": zeros(H),
            "ln1_g": ones(H), "ln1_b": zeros(H),
            "w1": dense((H, I)), "b1": zeros(I),
            "w2": dense((I, H)), "b2": zeros(H),
            "ln2_g": ones(H), "ln2_b": zeros(H),
        })
    return params


def prepare_params(params):
    """One-time packing OUTSIDE the jitted forward: QKV concat with 1/sqrt(DH) folded into the
    Q block, bf16 weight casts for MXU matmuls, (1,N) bias/LN reshapes, tied decoder transpose,
    bf16 word-embedding gather table, and pre-tiled position rows."""
    scale = 1.0 / math.sqrt(DH)
    acc = {k: [] for k in ("wqkv", "bqkv", "wo", "bo", "ln1_g", "ln1_b",
                           "w1", "b1", "w2", "b2", "ln2_g", "ln2_b")}
    for p in params["layers"]:
        acc["wqkv"].append(jnp.concatenate([p["wq"] * scale, p["wk"], p["wv"]], axis=1))
        acc["bqkv"].append(jnp.concatenate([p["bq"] * scale, p["bk"], p["bv"]]).reshape(1, 3 * H))
        acc["wo"].append(p["wo"]);  acc["bo"].append(p["bo"].reshape(1, H))
        acc["ln1_g"].append(p["ln1_g"].reshape(1, H)); acc["ln1_b"].append(p["ln1_b"].reshape(1, H))
        acc["w1"].append(p["w1"]);  acc["b1"].append(p["b1"].reshape(1, I))
        acc["w2"].append(p["w2"]);  acc["b2"].append(p["b2"].reshape(1, H))
        acc["ln2_g"].append(p["ln2_g"].reshape(1, H)); acc["ln2_b"].append(p["ln2_b"].reshape(1, H))

    def stack(name, dt=f32):
        return jnp.stack(acc[name]).astype(dt)

    prep = {
        "word_emb_bf": params["word_emb"].astype(bf16),            # (V, H) gather table
        "type_emb": params["type_emb"],                            # (2, H) f32
        "pos_tiled": jnp.tile(params["pos_emb"][:S], (B, 1)),      # (BS, H) f32
        "emb_ln_g": params["emb_ln_g"].reshape(1, H), "emb_ln_b": params["emb_ln_b"].reshape(1, H),
        "wqkv": stack("wqkv", bf16), "bqkv": stack("bqkv"),
        "wo": stack("wo", bf16), "bo": stack("bo"),
        "ln1_g": stack("ln1_g"), "ln1_b": stack("ln1_b"),
        "w1": stack("w1", bf16), "b1": stack("b1"),
        "w2": stack("w2", bf16), "b2": stack("b2"),
        "ln2_g": stack("ln2_g"), "ln2_b": stack("ln2_b"),
        "mlm_w": params["mlm_w"].astype(bf16), "mlm_b": params["mlm_b"].reshape(1, H),
        "mlm_ln_g": params["mlm_ln_g"].reshape(1, H), "mlm_ln_b": params["mlm_ln_b"].reshape(1, H),
        "dec_wt": params["word_emb"].T.astype(bf16),               # tied decoder weight, transposed once
        "dec_b": params["decoder_b"].reshape(1, V),
        "pool_w": params["pool_w"].astype(bf16), "pool_b": params["pool_b"].reshape(1, H),
        "nsp_w": params["nsp_w"].astype(bf16), "nsp_b": params["nsp_b"].reshape(1, 2),
    }
    return prep


# ---------------------------------- forward (glue + one fused kernel) ----------------------------------
def bert_pretraining_with_loss(prep, input_ids, is_masked, segment_ids, output_ids,
                               is_next_sentence):
    packed = fused_bert_forward(prep, input_ids, segment_ids, output_ids, is_masked,
                                is_next_sentence)
    total_loss = packed[0, 0:1]
    word_correct = (packed[0, 1:1 + BS] > 0.5).reshape(B, S)
    next_correct = packed[0, 1 + BS:1 + BS + B] > 0.5
    return total_loss, word_correct, next_correct


# ---------------------------------- main ----------------------------------
if __name__ == "__main__":
    key = jax.random.PRNGKey(0)
    k_par, k_ids, k_out, k_msk, k_nsp = jax.random.split(key, 5)

    params = init_params(k_par)
    prep = prepare_params(params)   # one-time packing outside jit

    input_ids = jax.random.randint(k_ids, (B, S), 1, V, dtype=jnp.int32)
    input_ids = input_ids.at[:, -1].set(0)                 # some padding -> exercises attention mask
    segment_ids = jnp.concatenate(
        [jnp.zeros((B, S // 2), jnp.int32), jnp.ones((B, S // 2), jnp.int32)], axis=1)
    output_ids = jax.random.randint(k_out, (B, S), 0, V, dtype=jnp.int32)
    is_masked = jax.random.bernoulli(k_msk, 0.3, (B, S))
    is_masked = is_masked.at[:, 1].set(True)               # guarantee at least one masked token
    is_next_sentence = jax.random.randint(k_nsp, (B,), 0, 2, dtype=jnp.int32)

    fwd = jax.jit(bert_pretraining_with_loss)
    loss, word_correct, next_correct = fwd(prep, input_ids, is_masked, segment_ids,
                                           output_ids, is_next_sentence)
    jax.block_until_ready((loss, word_correct, next_correct))

    assert loss.shape == (1,)
    assert word_correct.shape == (B, S) and word_correct.dtype == jnp.bool_
    assert next_correct.shape == (B,) and next_correct.dtype == jnp.bool_
    assert bool(jnp.isfinite(loss)[0])
    print("KERNEL_OK")
</pallas_src>

<mosaic_0001>
module attributes {stable_mosaic.version = 11 : i64} {
  func.func @_fused_bert_kernel(%arg0: memref<2x8xi32, #tpu.memory_space<vmem>>, %arg1: memref<16x1xi32, #tpu.memory_space<vmem>>, %arg2: memref<16x1xi32, #tpu.memory_space<vmem>>, %arg3: memref<16x1xi32, #tpu.memory_space<vmem>>, %arg4: memref<16x1xf32, #tpu.memory_space<vmem>>, %arg5: memref<2x1xi32, #tpu.memory_space<vmem>>, %arg6: memref<128x32xbf16, #tpu.memory_space<vmem>>, %arg7: memref<2x32xf32, #tpu.memory_space<vmem>>, %arg8: memref<16x32xf32, #tpu.memory_space<vmem>>, %arg9: memref<1x32xf32, #tpu.memory_space<vmem>>, %arg10: memref<1x32xf32, #tpu.memory_space<vmem>>, %arg11: memref<2x32x96xbf16, #tpu.memory_space<vmem>>, %arg12: memref<2x1x96xf32, #tpu.memory_space<vmem>>, %arg13: memref<2x32x32xbf16, #tpu.memory_space<vmem>>, %arg14: memref<2x1x32xf32, #tpu.memory_space<vmem>>, %arg15: memref<2x1x32xf32, #tpu.memory_space<vmem>>, %arg16: memref<2x1x32xf32, #tpu.memory_space<vmem>>, %arg17: memref<2x32x64xbf16, #tpu.memory_space<vmem>>, %arg18: memref<2x1x64xf32, #tpu.memory_space<vmem>>, %arg19: memref<2x64x32xbf16, #tpu.memory_space<vmem>>, %arg20: memref<2x1x32xf32, #tpu.memory_space<vmem>>, %arg21: memref<2x1x32xf32, #tpu.memory_space<vmem>>, %arg22: memref<2x1x32xf32, #tpu.memory_space<vmem>>, %arg23: memref<32x32xbf16, #tpu.memory_space<vmem>>, %arg24: memref<1x32xf32, #tpu.memory_space<vmem>>, %arg25: memref<1x32xf32, #tpu.memory_space<vmem>>, %arg26: memref<1x32xf32, #tpu.memory_space<vmem>>, %arg27: memref<32x128xbf16, #tpu.memory_space<vmem>>, %arg28: memref<1x128xf32, #tpu.memory_space<vmem>>, %arg29: memref<32x32xbf16, #tpu.memory_space<vmem>>, %arg30: memref<1x32xf32, #tpu.memory_space<vmem>>, %arg31: memref<32x2xbf16, #tpu.memory_space<vmem>>, %arg32: memref<1x2xf32, #tpu.memory_space<vmem>>, %arg33: memref<1x128xf32, #tpu.memory_space<vmem>>) attributes {dimension_semantics = [], scalar_prefetch = 0 : i64, scratch_operands = 0 : i64, tpu.core_type = #tpu.core_type<tc>} {
    %0 = tpu.iota {dimensions = array<i32: 1>} : vector<16x128xi32>
    %c0 = arith.constant 0 : index
    %c0_0 = arith.constant 0 : index
    %1 = vector.load %arg1[%c0, %c0_0] : memref<16x1xi32, #tpu.memory_space<vmem>>, vector<16x1xi32>
    %2 = vector.broadcast %1 : vector<16x1xi32> to vector<16x128xi32>
    %3 = arith.cmpi eq, %0, %2 : vector<16x128xi32>
    %4 = arith.extui %3 : vector<16x128xi1> to vector<16x128xi32>
    %5 = arith.sitofp %4 : vector<16x128xi32> to vector<16x128xf32>
    %6 = arith.truncf %5 : vector<16x128xf32> to vector<16x128xbf16>
    %c0_1 = arith.constant 0 : index
    %c0_2 = arith.constant 0 : index
    %7 = vector.load %arg6[%c0_1, %c0_2] : memref<128x32xbf16, #tpu.memory_space<vmem>>, vector<128x32xbf16>
    %cst = arith.constant dense<0.000000e+00> : vector<16x32xf32>
    %8 = tpu.matmul %6, %7, %cst {dimension_numbers = #tpu.dot_dimension_numbers<[1], [0], [0], [1], [0, 0, 1, 1], [], []>} : vector<16x128xbf16>, vector<128x32xbf16>, vector<16x32xf32> -> vector<16x32xf32>
    %c0_3 = arith.constant 0 : index
    %c0_4 = arith.constant 0 : index
    %9 = vector.load %arg7[%c0_3, %c0_4] : memref<2x32xf32, #tpu.memory_space<vmem>>, vector<2x32xf32>
    %c0_5 = arith.constant 0 : index
    %c0_6 = arith.constant 0 : index
    %10 = vector.load %arg2[%c0_5, %c0_6] : memref<16x1xi32, #tpu.memory_space<vmem>>, vector<16x1xi32>
    %c1_i32 = arith.constant 1 : i32
    %11 = vector.broadcast %c1_i32 : i32 to vector<16x1xi32>
    %12 = arith.cmpi eq, %10, %11 : vector<16x1xi32>
    %13 = vector.extract_strided_slice %9 {offsets = [1, 0], sizes = [1, 32], strides = [1, 1]} : vector<2x32xf32> to vector<1x32xf32>
    %14 = vector.extract_strided_slice %9 {offsets = [0, 0], sizes = [1, 32], strides = [1, 1]} : vector<2x32xf32> to vector<1x32xf32>
    %15 = vector.shape_cast %12 : vector<16x1xi1> to vector<16x1xi1>
    %16 = vector.broadcast %15 : vector<16x1xi1> to vector<16x32xi1>
    %17 = vector.shape_cast %13 : vector<1x32xf32> to vector<1x32xf32>
    %18 = vector.broadcast %17 : vector<1x32xf32> to vector<16x32xf32>
    %19 = vector.shape_cast %14 : vector<1x32xf32> to vector<1x32xf32>
    %20 = vector.broadcast %19 : vector<1x32xf32> to vector<16x32xf32>
    %21 = arith.select %16, %18, %20 : vector<16x32xi1>, vector<16x32xf32>
    %22 = arith.addf %8, %21 : vector<16x32xf32>
    %c0_7 = arith.constant 0 : index
    %c0_8 = arith.constant 0 : index
    %23 = vector.load %arg8[%c0_7, %c0_8] : memref<16x32xf32, #tpu.memory_space<vmem>>, vector<16x32xf32>
    %24 = arith.addf %22, %23 : vector<16x32xf32>
    %c0_9 = arith.constant 0 : index
    %c0_10 = arith.constant 0 : index
    %25 = vector.load %arg9[%c0_9, %c0_10] : memref<1x32xf32, #tpu.memory_space<vmem>>, vector<1x32xf32>
    %c0_11 = arith.constant 0 : index
    %c0_12 = arith.constant 0 : index
    %26 = vector.load %arg10[%c0_11, %c0_12] : memref<1x32xf32, #tpu.memory_space<vmem>>, vector<1x32xf32>
    %cst_13 = arith.constant dense<0.000000e+00> : vector<16xf32>
    %27 = vector.multi_reduction <add>, %24, %cst_13 [1] : vector<16x32xf32> to vector<16xf32>
    %28 = vector.shape_cast %27 : vector<16xf32> to vector<16x1xf32>
    %cst_14 = arith.constant 3.200000e+01 : f32
    %29 = vector.broadcast %cst_14 : f32 to vector<16x1xf32>
    %30 = arith.divf %28, %29 : vector<16x1xf32>
    %31 = vector.broadcast %30 : vector<16x1xf32> to vector<16x32xf32>
    %32 = arith.subf %24, %31 : vector<16x32xf32>
    %33 = arith.mulf %32, %32 : vector<16x32xf32>
    %cst_15 = arith.constant dense<0.000000e+00> : vector<16xf32>
    %34 = vector.multi_reduction <add>, %33, %cst_15 [1] : vector<16x32xf32> to vector<16xf32>
    %35 = vector.shape_cast %34 : vector<16xf32> to vector<16x1xf32>
    %cst_16 = arith.constant 3.200000e+01 : f32
    %36 = vector.broadcast %cst_16 : f32 to vector<16x1xf32>
    %37 = arith.divf %35, %36 : vector<16x1xf32>
    %38 = vector.broadcast %30 : vector<16x1xf32> to vector<16x32xf32>
    %39 = arith.subf %24, %38 : vector<16x32xf32>
    %cst_17 = arith.constant 9.99999996E-13 : f32
    %40 = vector.broadcast %cst_17 : f32 to vector<16x1xf32>
    %41 = arith.addf %37, %40 : vector<16x1xf32>
    %42 = math.rsqrt %41 : vector<16x1xf32>
    %43 = vector.broadcast %42 : vector<16x1xf32> to vector<16x32xf32>
    %44 = arith.mulf %39, %43 : vector<16x32xf32>
    %45 = vector.broadcast %25 : vector<1x32xf32> to vector<16x32xf32>
    %46 = arith.mulf %44, %45 : vector<16x32xf32>
    %47 = vector.broadcast %26 : vector<1x32xf32> to vector<16x32xf32>
    %48 = arith.addf %46, %47 : vector<16x32xf32>
    %49 = arith.truncf %48 : vector<16x32xf32> to vector<16x32xbf16>
    %c0_18 = arith.constant 0 : index
    %c0_19 = arith.constant 0 : index
    %50 = vector.load %arg0[%c0_18, %c0_19] : memref<2x8xi32, #tpu.memory_space<vmem>>, vector<2x8xi32>
    %c0_i32 = arith.constant 0 : i32
    %51 = vector.broadcast %c0_i32 : i32 to vector<2x8xi32>
    %52 = arith.cmpi eq, %50, %51 : vector<2x8xi32>
    %cst_20 = arith.constant -1.000000e+04 : f32
    %cst_21 = arith.constant 0.000000e+00 : f32
    %53 = vector.broadcast %cst_20 : f32 to vector<2x8xf32>
    %54 = vector.broadcast %cst_21 : f32 to vector<2x8xf32>
    %55 = arith.select %52, %53, %54 : vector<2x8xi1>, vector<2x8xf32>
    %56 = vector.shape_cast %55 : vector<2x8xf32> to vector<1x2x1x8xf32>
    %57 = vector.shape_cast %56 : vector<1x2x1x8xf32> to vector<1x2x1x8xf32>
    %58 = vector.broadcast %57 : vector<1x2x1x8xf32> to vector<2x2x1x8xf32>
    %59 = vector.shape_cast %58 : vector<2x2x1x8xf32> to vector<4x1x8xf32>
    %c0_22 = arith.constant 0 : index
    %c0_23 = arith.constant 0 : index
    %c0_24 = arith.constant 0 : index
    %60 = vector.load %arg11[%c0_22, %c0_23, %c0_24] : memref<2x32x96xbf16, #tpu.memory_space<vmem>>, vector<1x32x96xbf16>
    %61 = vector.shape_cast %60 : vector<1x32x96xbf16> to vector<32x96xbf16>
    %cst_25 = arith.constant dense<0.000000e+00> : vector<16x96xf32>
    %62 = tpu.matmul %49, %61, %cst_25 {dimension_numbers = #tpu.dot_dimension_numbers<[1], [0], [0], [1], [0, 0, 1, 1], [], []>} : vector<16x32xbf16>, vector<32x96xbf16>, vector<16x96xf32> -> vector<16x96xf32>
    %c0_26 = arith.constant 0 : index
    %c0_27 = arith.constant 0 : index
    %c0_28 = arith.constant 0 : index
    %63 = vector.load %arg12[%c0_26, %c0_27, %c0_28] : memref<2x1x96xf32, #tpu.memory_space<vmem>>, vector<1x1x96xf32>
    %64 = vector.shape_cast %63 : vector<1x1x96xf32> to vector<1x96xf32>
    %65 = vector.broadcast %64 : vector<1x96xf32> to vector<16x96xf32>
    %66 = arith.addf %62, %65 : vector<16x96xf32>
    %67 = vector.extract_strided_slice %66 {offsets = [0, 0], sizes = [16, 16], strides = [1, 1]} : vector<16x96xf32> to vector<16x16xf32>
    %68 = vector.shape_cast %67 : vector<16x16xf32> to vector<2x8x16xf32>
    %69 = vector.extract_strided_slice %66 {offsets = [0, 16], sizes = [16, 16], strides = [1, 1]} : vector<16x96xf32> to vector<16x16xf32>
    %70 = vector.shape_cast %69 : vector<16x16xf32> to vector<2x8x16xf32>
    %71 = tpu.concatenate %68, %70 in 0 : vector<2x8x16xf32>, vector<2x8x16xf32> -> vector<4x8x16xf32>
    %72 = arith.truncf %71 : vector<4x8x16xf32> to vector<4x8x16xbf16>
    %73 = vector.extract_strided_slice %66 {offsets = [0, 32], sizes = [16, 16], strides = [1, 1]} : vector<16x96xf32> to vector<16x16xf32>
    %74 = vector.shape_cast %73 : vector<16x16xf32> to vector<2x8x16xf32>
    %75 = vector.extract_strided_slice %66 {offsets = [0, 48], sizes = [16, 16], strides = [1, 1]} : vector<16x96xf32> to vector<16x16xf32>
    %76 = vector.shape_cast %75 : vector<16x16xf32> to vector<2x8x16xf32>
    %77 = tpu.concatenate %74, %76 in 0 : vector<2x8x16xf32>, vector<2x8x16xf32> -> vector<4x8x16xf32>
    %78 = arith.truncf %77 : vector<4x8x16xf32> to vector<4x8x16xbf16>
    %79 = vector.extract_strided_slice %66 {offsets = [0, 64], sizes = [16, 16], strides = [1, 1]} : vector<16x96xf32> to vector<16x16xf32>
    %80 = vector.shape_cast %79 : vector<16x16xf32> to vector<2x8x16xf32>
    %81 = vector.extract_strided_slice %66 {offsets = [0, 80], sizes = [16, 16], strides = [1, 1]} : vector<16x96xf32> to vector<16x16xf32>
    %82 = vector.shape_cast %81 : vector<16x16xf32> to vector<2x8x16xf32>
    %83 = tpu.concatenate %80, %82 in 0 : vector<2x8x16xf32>, vector<2x8x16xf32> -> vector<4x8x16xf32>
    %84 = arith.truncf %83 : vector<4x8x16xf32> to vector<4x8x16xbf16>
    "tpu.trace_start"() <{level = 10 : i32, message = "nqd,nkd->nqk"}> : () -> ()
    %cst_29 = arith.constant dense<0.000000e+00> : vector<4x8x8xf32>
    %85 = tpu.matmul %72, %78, %cst_29 {dimension_numbers = #tpu.dot_dimension_numbers<[2], [2], [1], [1], [0, 0, 0, 1, 1, 1], [0], [0]>} : vector<4x8x16xbf16>, vector<4x8x16xbf16>, vector<4x8x8xf32> -> vector<4x8x8xf32>
    "tpu.trace_stop"() : () -> ()
    %86 = vector.broadcast %59 : vector<4x1x8xf32> to vector<4x8x8xf32>
    %87 = arith.addf %85, %86 : vector<4x8x8xf32>
    %cst_30 = arith.constant dense<0xFF800000> : vector<4x8xf32>
    %88 = vector.multi_reduction <maximumf>, %87, %cst_30 [2] : vector<4x8x8xf32> to vector<4x8xf32>
    %89 = vector.shape_cast %88 : vector<4x8xf32> to vector<4x8x1xf32>
    %90 = vector.broadcast %89 : vector<4x8x1xf32> to vector<4x8x8xf32>
    %91 = arith.subf %87, %90 : vector<4x8x8xf32>
    %92 = math.exp %91 : vector<4x8x8xf32>
    %93 = arith.truncf %92 : vector<4x8x8xf32> to vector<4x8x8xbf16>
    "tpu.trace_start"() <{level = 10 : i32, message = "nqk,nkd->nqd"}> : () -> ()
    %cst_31 = arith.constant dense<0.000000e+00> : vector<4x8x16xf32>
    %94 = tpu.matmul %93, %84, %cst_31 {dimension_numbers = #tpu.dot_dimension_numbers<[2], [1], [1], [2], [0, 0, 0, 1, 1, 2], [0], [0]>} : vector<4x8x8xbf16>, vector<4x8x16xbf16>, vector<4x8x16xf32> -> vector<4x8x16xf32>
    "tpu.trace_stop"() : () -> ()
    %cst_32 = arith.constant dense<0.000000e+00> : vector<4x8xf32>
    %95 = vector.multi_reduction <add>, %92, %cst_32 [2] : vector<4x8x8xf32> to vector<4x8xf32>
    %96 = vector.shape_cast %95 : vector<4x8xf32> to vector<4x8x1xf32>
    %97 = tpu.reciprocal %96 {approx = true} : vector<4x8x1xf32> -> vector<4x8x1xf32>
    %98 = vector.broadcast %97 : vector<4x8x1xf32> to vector<4x8x16xf32>
    %99 = arith.mulf %94, %98 : vector<4x8x16xf32>
    %100 = vector.extract_strided_slice %99 {offsets = [0, 0, 0], sizes = [2, 8, 16], strides = [1, 1, 1]} : vector<4x8x16xf32> to vector<2x8x16xf32>
    %101 = vector.shape_cast %100 : vector<2x8x16xf32> to vector<16x16xf32>
    %102 = vector.extract_strided_slice %99 {offsets = [2, 0, 0], sizes = [2, 8, 16], strides = [1, 1, 1]} : vector<4x8x16xf32> to vector<2x8x16xf32>
    %103 = vector.shape_cast %102 : vector<2x8x16xf32> to vector<16x16xf32>
    %104 = tpu.concatenate %101, %103 in 1 : vector<16x16xf32>, vector<16x16xf32> -> vector<16x32xf32>
    %105 = arith.truncf %104 : vector<16x32xf32> to vector<16x32xbf16>
    %c0_33 = arith.constant 0 : index
    %c0_34 = arith.constant 0 : index
    %c0_35 = arith.constant 0 : index
    %106 = vector.load %arg13[%c0_33, %c0_34, %c0_35] : memref<2x32x32xbf16, #tpu.memory_space<vmem>>, vector<1x32x32xbf16>
    %107 = vector.shape_cast %106 : vector<1x32x32xbf16> to vector<32x32xbf16>
    %cst_36 = arith.constant dense<0.000000e+00> : vector<16x32xf32>
    %108 = tpu.matmul %105, %107, %cst_36 {dimension_numbers = #tpu.dot_dimension_numbers<[1], [0], [0], [1], [0, 0, 1, 1], [], []>} : vector<16x32xbf16>, vector<32x32xbf16>, vector<16x32xf32> -> vector<16x32xf32>
    %c0_37 = arith.constant 0 : index
    %c0_38 = arith.constant 0 : index
    %c0_39 = arith.constant 0 : index
    %109 = vector.load %arg14[%c0_37, %c0_38, %c0_39] : memref<2x1x32xf32, #tpu.memory_space<vmem>>, vector<1x1x32xf32>
    %110 = vector.shape_cast %109 : vector<1x1x32xf32> to vector<1x32xf32>
    %111 = vector.broadcast %110 : vector<1x32xf32> to vector<16x32xf32>
    %112 = arith.addf %108, %111 : vector<16x32xf32>
    %113 = arith.addf %112, %48 : vector<16x32xf32>
    %c0_40 = arith.constant 0 : index
    %c0_41 = arith.constant 0 : index
    %c0_42 = arith.constant 0 : index
    %114 = vector.load %arg15[%c0_40, %c0_41, %c0_42] : memref<2x1x32xf32, #tpu.memory_space<vmem>>, vector<1x1x32xf32>
    %115 = vector.shape_cast %114 : vector<1x1x32xf32> to vector<1x32xf32>
    %c0_43 = arith.constant 0 : index
    %c0_44 = arith.constant 0 : index
    %c0_45 = arith.constant 0 : index
    %116 = vector.load %arg16[%c0_43, %c0_44, %c0_45] : memref<2x1x32xf32, #tpu.memory_space<vmem>>, vector<1x1x32xf32>
    %117 = vector.shape_cast %116 : vector<1x1x32xf32> to vector<1x32xf32>
    %cst_46 = arith.constant dense<0.000000e+00> : vector<16xf32>
    %118 = vector.multi_reduction <add>, %113, %cst_46 [1] : vector<16x32xf32> to vector<16xf32>
    %119 = vector.shape_cast %118 : vector<16xf32> to vector<16x1xf32>
    %cst_47 = arith.constant 3.200000e+01 : f32
    %120 = vector.broadcast %cst_47 : f32 to vector<16x1xf32>
    %121 = arith.divf %119, %120 : vector<16x1xf32>
    %122 = vector.broadcast %121 : vector<16x1xf32> to vector<16x32xf32>
    %123 = arith.subf %113, %122 : vector<16x32xf32>
    %124 = arith.mulf %123, %123 : vector<16x32xf32>
    %cst_48 = arith.constant dense<0.000000e+00> : vector<16xf32>
    %125 = vector.multi_reduction <add>, %124, %cst_48 [1] : vector<16x32xf32> to vector<16xf32>
    %126 = vector.shape_cast %125 : vector<16xf32> to vector<16x1xf32>
    %cst_49 = arith.constant 3.200000e+01 : f32
    %127 = vector.broadcast %cst_49 : f32 to vector<16x1xf32>
    %128 = arith.divf %126, %127 : vector<16x1xf32>
    %129 = vector.broadcast %121 : vector<16x1xf32> to vector<16x32xf32>
    %130 = arith.subf %113, %129 : vector<16x32xf32>
    %cst_50 = arith.constant 9.99999996E-13 : f32
    %131 = vector.broadcast %cst_50 : f32 to vector<16x1xf32>
    %132 = arith.addf %128, %131 : vector<16x1xf32>
    %133 = math.rsqrt %132 : vector<16x1xf32>
    %134 = vector.broadcast %133 : vector<16x1xf32> to vector<16x32xf32>
    %135 = arith.mulf %130, %134 : vector<16x32xf32>
    %136 = vector.broadcast %115 : vector<1x32xf32> to vector<16x32xf32>
    %137 = arith.mulf %135, %136 : vector<16x32xf32>
    %138 = vector.broadcast %117 : vector<1x32xf32> to vector<16x32xf32>
    %139 = arith.addf %137, %138 : vector<16x32xf32>
    %140 = arith.truncf %139 : vector<16x32xf32> to vector<16x32xbf16>
    %c0_51 = arith.constant 0 : index
    %c0_52 = arith.constant 0 : index
    %c0_53 = arith.constant 0 : index
    %141 = vector.load %arg17[%c0_51, %c0_52, %c0_53] : memref<2x32x64xbf16, #tpu.memory_space<vmem>>, vector<1x32x64xbf16>
    %142 = vector.shape_cast %141 : vector<1x32x64xbf16> to vector<32x64xbf16>
    %cst_54 = arith.constant dense<0.000000e+00> : vector<16x64xf32>
    %143 = tpu.matmul %140, %142, %cst_54 {dimension_numbers = #tpu.dot_dimension_numbers<[1], [0], [0], [1], [0, 0, 1, 1], [], []>} : vector<16x32xbf16>, vector<32x64xbf16>, vector<16x64xf32> -> vector<16x64xf32>
    %c0_55 = arith.constant 0 : index
    %c0_56 = arith.constant 0 : index
    %c0_57 = arith.constant 0 : index
    %144 = vector.load %arg18[%c0_55, %c0_56, %c0_57] : memref<2x1x64xf32, #tpu.memory_space<vmem>>, vector<1x1x64xf32>
    %145 = vector.shape_cast %144 : vector<1x1x64xf32> to vector<1x64xf32>
    %146 = vector.broadcast %145 : vector<1x64xf32> to vector<16x64xf32>
    %147 = arith.addf %143, %146 : vector<16x64xf32>
    %cst_58 = arith.constant 5.000000e-01 : f32
    %148 = vector.broadcast %cst_58 : f32 to vector<16x64xf32>
    %149 = arith.mulf %148, %147 : vector<16x64xf32>
    %cst_59 = arith.constant 4.471500e-02 : f32
    %150 = vector.broadcast %cst_59 : f32 to vector<16x64xf32>
    %151 = arith.mulf %150, %147 : vector<16x64xf32>
    %152 = arith.mulf %151, %147 : vector<16x64xf32>
    %153 = arith.mulf %152, %147 : vector<16x64xf32>
    %154 = arith.addf %147, %153 : vector<16x64xf32>
    %cst_60 = arith.constant 0.797884583 : f32
    %155 = vector.broadcast %cst_60 : f32 to vector<16x64xf32>
    %156 = arith.mulf %155, %154 : vector<16x64xf32>
    %157 = math.tanh %156 : vector<16x64xf32>
    %cst_61 = arith.constant 1.000000e+00 : f32
    %158 = vector.broadcast %cst_61 : f32 to vector<16x64xf32>
    %159 = arith.addf %158, %157 : vector<16x64xf32>
    %160 = arith.mulf %149, %159 : vector<16x64xf32>
    %161 = arith.truncf %160 : vector<16x64xf32> to vector<16x64xbf16>
    %c0_62 = arith.constant 0 : index
    %c0_63 = arith.constant 0 : index
    %c0_64 = arith.constant 0 : index
    %162 = vector.load %arg19[%c0_62, %c0_63, %c0_64] : memref<2x64x32xbf16, #tpu.memory_space<vmem>>, vector<1x64x32xbf16>
    %163 = vector.shape_cast %162 : vector<1x64x32xbf16> to vector<64x32xbf16>
    %cst_65 = arith.constant dense<0.000000e+00> : vector<16x32xf32>
    %164 = tpu.matmul %161, %163, %cst_65 {dimension_numbers = #tpu.dot_dimension_numbers<[1], [0], [0], [1], [0, 0, 1, 1], [], []>} : vector<16x64xbf16>, vector<64x32xbf16>, vector<16x32xf32> -> vector<16x32xf32>
    %c0_66 = arith.constant 0 : index
    %c0_67 = arith.constant 0 : index
    %c0_68 = arith.constant 0 : index
    %165 = vector.load %arg20[%c0_66, %c0_67, %c0_68] : memref<2x1x32xf32, #tpu.memory_space<vmem>>, vector<1x1x32xf32>
    %166 = vector.shape_cast %165 : vector<1x1x32xf32> to vector<1x32xf32>
    %167 = vector.broadcast %166 : vector<1x32xf32> to vector<16x32xf32>
    %168 = arith.addf %164, %167 : vector<16x32xf32>
    %169 = arith.addf %168, %139 : vector<16x32xf32>
    %c0_69 = arith.constant 0 : index
    %c0_70 = arith.constant 0 : index
    %c0_71 = arith.constant 0 : index
    %170 = vector.load %arg21[%c0_69, %c0_70, %c0_71] : memref<2x1x32xf32, #tpu.memory_space<vmem>>, vector<1x1x32xf32>
    %171 = vector.shape_cast %170 : vector<1x1x32xf32> to vector<1x32xf32>
    %c0_72 = arith.constant 0 : index
    %c0_73 = arith.constant 0 : index
    %c0_74 = arith.constant 0 : index
    %172 = vector.load %arg22[%c0_72, %c0_73, %c0_74] : memref<2x1x32xf32, #tpu.memory_space<vmem>>, vector<1x1x32xf32>
    %173 = vector.shape_cast %172 : vector<1x1x32xf32> to vector<1x32xf32>
    %cst_75 = arith.constant dense<0.000000e+00> : vector<16xf32>
    %174 = vector.multi_reduction <add>, %169, %cst_75 [1] : vector<16x32xf32> to vector<16xf32>
    %175 = vector.shape_cast %174 : vector<16xf32> to vector<16x1xf32>
    %cst_76 = arith.constant 3.200000e+01 : f32
    %176 = vector.broadcast %cst_76 : f32 to vector<16x1xf32>
    %177 = arith.divf %175, %176 : vector<16x1xf32>
    %178 = vector.broadcast %177 : vector<16x1xf32> to vector<16x32xf32>
    %179 = arith.subf %169, %178 : vector<16x32xf32>
    %180 = arith.mulf %179, %179 : vector<16x32xf32>
    %cst_77 = arith.constant dense<0.000000e+00> : vector<16xf32>
    %181 = vector.multi_reduction <add>, %180, %cst_77 [1] : vector<16x32xf32> to vector<16xf32>
    %182 = vector.shape_cast %181 : vector<16xf32> to vector<16x1xf32>
    %cst_78 = arith.constant 3.200000e+01 : f32
    %183 = vector.broadcast %cst_78 : f32 to vector<16x1xf32>
    %184 = arith.divf %182, %183 : vector<16x1xf32>
    %185 = vector.broadcast %177 : vector<16x1xf32> to vector<16x32xf32>
    %186 = arith.subf %169, %185 : vector<16x32xf32>
    %cst_79 = arith.constant 9.99999996E-13 : f32
    %187 = vector.broadcast %cst_79 : f32 to vector<16x1xf32>
    %188 = arith.addf %184, %187 : vector<16x1xf32>
    %189 = math.rsqrt %188 : vector<16x1xf32>
    %190 = vector.broadcast %189 : vector<16x1xf32> to vector<16x32xf32>
    %191 = arith.mulf %186, %190 : vector<16x32xf32>
    %192 = vector.broadcast %171 : vector<1x32xf32> to vector<16x32xf32>
    %193 = arith.mulf %191, %192 : vector<16x32xf32>
    %194 = vector.broadcast %173 : vector<1x32xf32> to vector<16x32xf32>
    %195 = arith.addf %193, %194 : vector<16x32xf32>
    %196 = arith.truncf %195 : vector<16x32xf32> to vector<16x32xbf16>
    %c1 = arith.constant 1 : index
    %c0_80 = arith.constant 0 : index
    %c0_81 = arith.constant 0 : index
    %197 = vector.load %arg11[%c1, %c0_80, %c0_81] : memref<2x32x96xbf16, #tpu.memory_space<vmem>>, vector<1x32x96xbf16>
    %198 = vector.shape_cast %197 : vector<1x32x96xbf16> to vector<32x96xbf16>
    %cst_82 = arith.constant dense<0.000000e+00> : vector<16x96xf32>
    %199 = tpu.matmul %196, %198, %cst_82 {dimension_numbers = #tpu.dot_dimension_numbers<[1], [0], [0], [1], [0, 0, 1, 1], [], []>} : vector<16x32xbf16>, vector<32x96xbf16>, vector<16x96xf32> -> vector<16x96xf32>
    %c1_83 = arith.constant 1 : index
    %c0_84 = arith.constant 0 : index
    %c0_85 = arith.constant 0 : index
    %200 = vector.load %arg12[%c1_83, %c0_84, %c0_85] : memref<2x1x96xf32, #tpu.memory_space<vmem>>, vector<1x1x96xf32>
    %201 = vector.shape_cast %200 : vector<1x1x96xf32> to vector<1x96xf32>
    %202 = vector.broadcast %201 : vector<1x96xf32> to vector<16x96xf32>
    %203 = arith.addf %199, %202 : vector<16x96xf32>
    %204 = vector.extract_strided_slice %203 {offsets = [0, 0], sizes = [16, 16], strides = [1, 1]} : vector<16x96xf32> to vector<16x16xf32>
    %205 = vector.shape_cast %204 : vector<16x16xf32> to vector<2x8x16xf32>
    %206 = vector.extract_strided_slice %203 {offsets = [0, 16], sizes = [16, 16], strides = [1, 1]} : vector<16x96xf32> to vector<16x16xf32>
    %207 = vector.shape_cast %206 : vector<16x16xf32> to vector<2x8x16xf32>
    %208 = tpu.concatenate %205, %207 in 0 : vector<2x8x16xf32>, vector<2x8x16xf32> -> vector<4x8x16xf32>
    %209 = arith.truncf %208 : vector<4x8x16xf32> to vector<4x8x16xbf16>
    %210 = vector.extract_strided_slice %203 {offsets = [0, 32], sizes = [16, 16], strides = [1, 1]} : vector<16x96xf32> to vector<16x16xf32>
    %211 = vector.shape_cast %210 : vector<16x16xf32> to vector<2x8x16xf32>
    %212 = vector.extract_strided_slice %203 {offsets = [0, 48], sizes = [16, 16], strides = [1, 1]} : vector<16x96xf32> to vector<16x16xf32>
    %213 = vector.shape_cast %212 : vector<16x16xf32> to vector<2x8x16xf32>
    %214 = tpu.concatenate %211, %213 in 0 : vector<2x8x16xf32>, vector<2x8x16xf32> -> vector<4x8x16xf32>
    %215 = arith.truncf %214 : vector<4x8x16xf32> to vector<4x8x16xbf16>
    %216 = vector.extract_strided_slice %203 {offsets = [0, 64], sizes = [16, 16], strides = [1, 1]} : vector<16x96xf32> to vector<16x16xf32>
    %217 = vector.shape_cast %216 : vector<16x16xf32> to vector<2x8x16xf32>
    %218 = vector.extract_strided_slice %203 {offsets = [0, 80], sizes = [16, 16], strides = [1, 1]} : vector<16x96xf32> to vector<16x16xf32>
    %219 = vector.shape_cast %218 : vector<16x16xf32> to vector<2x8x16xf32>
    %220 = tpu.concatenate %217, %219 in 0 : vector<2x8x16xf32>, vector<2x8x16xf32> -> vector<4x8x16xf32>
    %221 = arith.truncf %220 : vector<4x8x16xf32> to vector<4x8x16xbf16>
    "tpu.trace_start"() <{level = 10 : i32, message = "nqd,nkd->nqk"}> : () -> ()
    %cst_86 = arith.constant dense<0.000000e+00> : vector<4x8x8xf32>
    %222 = tpu.matmul %209, %215, %cst_86 {dimension_numbers = #tpu.dot_dimension_numbers<[2], [2], [1], [1], [0, 0, 0, 1, 1, 1], [0], [0]>} : vector<4x8x16xbf16>, vector<4x8x16xbf16>, vector<4x8x8xf32> -> vector<4x8x8xf32>
    "tpu.trace_stop"() : () -> ()
    %223 = vector.broadcast %59 : vector<4x1x8xf32> to vector<4x8x8xf32>
    %224 = arith.addf %222, %223 : vector<4x8x8xf32>
    %cst_87 = arith.constant dense<0xFF800000> : vector<4x8xf32>
    %225 = vector.multi_reduction <maximumf>, %224, %cst_87 [2] : vector<4x8x8xf32> to vector<4x8xf32>
    %226 = vector.shape_cast %225 : vector<4x8xf32> to vector<4x8x1xf32>
    %227 = vector.broadcast %226 : vector<4x8x1xf32> to vector<4x8x8xf32>
    %228 = arith.subf %224, %227 : vector<4x8x8xf32>
    %229 = math.exp %228 : vector<4x8x8xf32>
    %230 = arith.truncf %229 : vector<4x8x8xf32> to vector<4x8x8xbf16>
    "tpu.trace_start"() <{level = 10 : i32, message = "nqk,nkd->nqd"}> : () -> ()
    %cst_88 = arith.constant dense<0.000000e+00> : vector<4x8x16xf32>
    %231 = tpu.matmul %230, %221, %cst_88 {dimension_numbers = #tpu.dot_dimension_numbers<[2], [1], [1], [2], [0, 0, 0, 1, 1, 2], [0], [0]>} : vector<4x8x8xbf16>, vector<4x8x16xbf16>, vector<4x8x16xf32> -> vector<4x8x16xf32>
    "tpu.trace_stop"() : () -> ()
    %cst_89 = arith.constant dense<0.000000e+00> : vector<4x8xf32>
    %232 = vector.multi_reduction <add>, %229, %cst_89 [2] : vector<4x8x8xf32> to vector<4x8xf32>
    %233 = vector.shape_cast %232 : vector<4x8xf32> to vector<4x8x1xf32>
    %234 = tpu.reciprocal %233 {approx = true} : vector<4x8x1xf32> -> vector<4x8x1xf32>
    %235 = vector.broadcast %234 : vector<4x8x1xf32> to vector<4x8x16xf32>
    %236 = arith.mulf %231, %235 : vector<4x8x16xf32>
    %237 = vector.extract_strided_slice %236 {offsets = [0, 0, 0], sizes = [2, 8, 16], strides = [1, 1, 1]} : vector<4x8x16xf32> to vector<2x8x16xf32>
    %238 = vector.shape_cast %237 : vector<2x8x16xf32> to vector<16x16xf32>
    %239 = vector.extract_strided_slice %236 {offsets = [2, 0, 0], sizes = [2, 8, 16], strides = [1, 1, 1]} : vector<4x8x16xf32> to vector<2x8x16xf32>
    %240 = vector.shape_cast %239 : vector<2x8x16xf32> to vector<16x16xf32>
    %241 = tpu.concatenate %238, %240 in 1 : vector<16x16xf32>, vector<16x16xf32> -> vector<16x32xf32>
    %242 = arith.truncf %241 : vector<16x32xf32> to vector<16x32xbf16>
    %c1_90 = arith.constant 1 : index
    %c0_91 = arith.constant 0 : index
    %c0_92 = arith.constant 0 : index
    %243 = vector.load %arg13[%c1_90, %c0_91, %c0_92] : memref<2x32x32xbf16, #tpu.memory_space<vmem>>, vector<1x32x32xbf16>
    %244 = vector.shape_cast %243 : vector<1x32x32xbf16> to vector<32x32xbf16>
    %cst_93 = arith.constant dense<0.000000e+00> : vector<16x32xf32>
    %245 = tpu.matmul %242, %244, %cst_93 {dimension_numbers = #tpu.dot_dimension_numbers<[1], [0], [0], [1], [0, 0, 1, 1], [], []>} : vector<16x32xbf16>, vector<32x32xbf16>, vector<16x32xf32> -> vector<16x32xf32>
    %c1_94 = arith.constant 1 : index
    %c0_95 = arith.constant 0 : index
    %c0_96 = arith.constant 0 : index
    %246 = vector.load %arg14[%c1_94, %c0_95, %c0_96] : memref<2x1x32xf32, #tpu.memory_space<vmem>>, vector<1x1x32xf32>
    %247 = vector.shape_cast %246 : vector<1x1x32xf32> to vector<1x32xf32>
    %248 = vector.broadcast %247 : vector<1x32xf32> to vector<16x32xf32>
    %249 = arith.addf %245, %248 : vector<16x32xf32>
    %250 = arith.addf %249, %195 : vector<16x32xf32>
    %c1_97 = arith.constant 1 : index
    %c0_98 = arith.constant 0 : index
    %c0_99 = arith.constant 0 : index
    %251 = vector.load %arg15[%c1_97, %c0_98, %c0_99] : memref<2x1x32xf32, #tpu.memory_space<vmem>>, vector<1x1x32xf32>
    %252 = vector.shape_cast %251 : vector<1x1x32xf32> to vector<1x32xf32>
    %c1_100 = arith.constant 1 : index
    %c0_101 = arith.constant 0 : index
    %c0_102 = arith.constant 0 : index
    %253 = vector.load %arg16[%c1_100, %c0_101, %c0_102] : memref<2x1x32xf32, #tpu.memory_space<vmem>>, vector<1x1x32xf32>
    %254 = vector.shape_cast %253 : vector<1x1x32xf32> to vector<1x32xf32>
    %cst_103 = arith.constant dense<0.000000e+00> : vector<16xf32>
    %255 = vector.multi_reduction <add>, %250, %cst_103 [1] : vector<16x32xf32> to vector<16xf32>
    %256 = vector.shape_cast %255 : vector<16xf32> to vector<16x1xf32>
    %cst_104 = arith.constant 3.200000e+01 : f32
    %257 = vector.broadcast %cst_104 : f32 to vector<16x1xf32>
    %258 = arith.divf %256, %257 : vector<16x1xf32>
    %259 = vector.broadcast %258 : vector<16x1xf32> to vector<16x32xf32>
    %260 = arith.subf %250, %259 : vector<16x32xf32>
    %261 = arith.mulf %260, %260 : vector<16x32xf32>
    %cst_105 = arith.constant dense<0.000000e+00> : vector<16xf32>
    %262 = vector.multi_reduction <add>, %261, %cst_105 [1] : vector<16x32xf32> to vector<16xf32>
    %263 = vector.shape_cast %262 : vector<16xf32> to vector<16x1xf32>
    %cst_106 = arith.constant 3.200000e+01 : f32
    %264 = vector.broadcast %cst_106 : f32 to vector<16x1xf32>
    %265 = arith.divf %263, %264 : vector<16x1xf32>
    %266 = vector.broadcast %258 : vector<16x1xf32> to vector<16x32xf32>
    %267 = arith.subf %250, %266 : vector<16x32xf32>
    %cst_107 = arith.constant 9.99999996E-13 : f32
    %268 = vector.broadcast %cst_107 : f32 to vector<16x1xf32>
    %269 = arith.addf %265, %268 : vector<16x1xf32>
    %270 = math.rsqrt %269 : vector<16x1xf32>
    %271 = vector.broadcast %270 : vector<16x1xf32> to vector<16x32xf32>
    %272 = arith.mulf %267, %271 : vector<16x32xf32>
    %273 = vector.broadcast %252 : vector<1x32xf32> to vector<16x32xf32>
    %274 = arith.mulf %272, %273 : vector<16x32xf32>
    %275 = vector.broadcast %254 : vector<1x32xf32> to vector<16x32xf32>
    %276 = arith.addf %274, %275 : vector<16x32xf32>
    %277 = arith.truncf %276 : vector<16x32xf32> to vector<16x32xbf16>
    %c1_108 = arith.constant 1 : index
    %c0_109 = arith.constant 0 : index
    %c0_110 = arith.constant 0 : index
    %278 = vector.load %arg17[%c1_108, %c0_109, %c0_110] : memref<2x32x64xbf16, #tpu.memory_space<vmem>>, vector<1x32x64xbf16>
    %279 = vector.shape_cast %278 : vector<1x32x64xbf16> to vector<32x64xbf16>
    %cst_111 = arith.constant dense<0.000000e+00> : vector<16x64xf32>
    %280 = tpu.matmul %277, %279, %cst_111 {dimension_numbers = #tpu.dot_dimension_numbers<[1], [0], [0], [1], [0, 0, 1, 1], [], []>} : vector<16x32xbf16>, vector<32x64xbf16>, vector<16x64xf32> -> vector<16x64xf32>
    %c1_112 = arith.constant 1 : index
    %c0_113 = arith.constant 0 : index
    %c0_114 = arith.constant 0 : index
    %281 = vector.load %arg18[%c1_112, %c0_113, %c0_114] : memref<2x1x64xf32, #tpu.memory_space<vmem>>, vector<1x1x64xf32>
    %282 = vector.shape_cast %281 : vector<1x1x64xf32> to vector<1x64xf32>
    %283 = vector.broadcast %282 : vector<1x64xf32> to vector<16x64xf32>
    %284 = arith.addf %280, %283 : vector<16x64xf32>
    %cst_115 = arith.constant 5.000000e-01 : f32
    %285 = vector.broadcast %cst_115 : f32 to vector<16x64xf32>
    %286 = arith.mulf %285, %284 : vector<16x64xf32>
    %cst_116 = arith.constant 4.471500e-02 : f32
    %287 = vector.broadcast %cst_116 : f32 to vector<16x64xf32>
    %288 = arith.mulf %287, %284 : vector<16x64xf32>
    %289 = arith.mulf %288, %284 : vector<16x64xf32>
    %290 = arith.mulf %289, %284 : vector<16x64xf32>
    %291 = arith.addf %284, %290 : vector<16x64xf32>
    %cst_117 = arith.constant 0.797884583 : f32
    %292 = vector.broadcast %cst_117 : f32 to vector<16x64xf32>
    %293 = arith.mulf %292, %291 : vector<16x64xf32>
    %294 = math.tanh %293 : vector<16x64xf32>
    %cst_118 = arith.constant 1.000000e+00 : f32
    %295 = vector.broadcast %cst_118 : f32 to vector<16x64xf32>
    %296 = arith.addf %295, %294 : vector<16x64xf32>
    %297 = arith.mulf %286, %296 : vector<16x64xf32>
    %298 = arith.truncf %297 : vector<16x64xf32> to vector<16x64xbf16>
    %c1_119 = arith.constant 1 : index
    %c0_120 = arith.constant 0 : index
    %c0_121 = arith.constant 0 : index
    %299 = vector.load %arg19[%c1_119, %c0_120, %c0_121] : memref<2x64x32xbf16, #tpu.memory_space<vmem>>, vector<1x64x32xbf16>
    %300 = vector.shape_cast %299 : vector<1x64x32xbf16> to vector<64x32xbf16>
    %cst_122 = arith.constant dense<0.000000e+00> : vector<16x32xf32>
    %301 = tpu.matmul %298, %300, %cst_122 {dimension_numbers = #tpu.dot_dimension_numbers<[1], [0], [0], [1], [0, 0, 1, 1], [], []>} : vector<16x64xbf16>, vector<64x32xbf16>, vector<16x32xf32> -> vector<16x32xf32>
    %c1_123 = arith.constant 1 : index
    %c0_124 = arith.constant 0 : index
    %c0_125 = arith.constant 0 : index
    %302 = vector.load %arg20[%c1_123, %c0_124, %c0_125] : memref<2x1x32xf32, #tpu.memory_space<vmem>>, vector<1x1x32xf32>
    %303 = vector.shape_cast %302 : vector<1x1x32xf32> to vector<1x32xf32>
    %304 = vector.broadcast %303 : vector<1x32xf32> to vector<16x32xf32>
    %305 = arith.addf %301, %304 : vector<16x32xf32>
    %306 = arith.addf %305, %276 : vector<16x32xf32>
    %c1_126 = arith.constant 1 : index
    %c0_127 = arith.constant 0 : index
    %c0_128 = arith.constant 0 : index
    %307 = vector.load %arg21[%c1_126, %c0_127, %c0_128] : memref<2x1x32xf32, #tpu.memory_space<vmem>>, vector<1x1x32xf32>
    %308 = vector.shape_cast %307 : vector<1x1x32xf32> to vector<1x32xf32>
    %c1_129 = arith.constant 1 : index
    %c0_130 = arith.constant 0 : index
    %c0_131 = arith.constant 0 : index
    %309 = vector.load %arg22[%c1_129, %c0_130, %c0_131] : memref<2x1x32xf32, #tpu.memory_space<vmem>>, vector<1x1x32xf32>
    %310 = vector.shape_cast %309 : vector<1x1x32xf32> to vector<1x32xf32>
    %cst_132 = arith.constant dense<0.000000e+00> : vector<16xf32>
    %311 = vector.multi_reduction <add>, %306, %cst_132 [1] : vector<16x32xf32> to vector<16xf32>
    %312 = vector.shape_cast %311 : vector<16xf32> to vector<16x1xf32>
    %cst_133 = arith.constant 3.200000e+01 : f32
    %313 = vector.broadcast %cst_133 : f32 to vector<16x1xf32>
    %314 = arith.divf %312, %313 : vector<16x1xf32>
    %315 = vector.broadcast %314 : vector<16x1xf32> to vector<16x32xf32>
    %316 = arith.subf %306, %315 : vector<16x32xf32>
    %317 = arith.mulf %316, %316 : vector<16x32xf32>
    %cst_134 = arith.constant dense<0.000000e+00> : vector<16xf32>
    %318 = vector.multi_reduction <add>, %317, %cst_134 [1] : vector<16x32xf32> to vector<16xf32>
    %319 = vector.shape_cast %318 : vector<16xf32> to vector<16x1xf32>
    %cst_135 = arith.constant 3.200000e+01 : f32
    %320 = vector.broadcast %cst_135 : f32 to vector<16x1xf32>
    %321 = arith.divf %319, %320 : vector<16x1xf32>
    %322 = vector.broadcast %314 : vector<16x1xf32> to vector<16x32xf32>
    %323 = arith.subf %306, %322 : vector<16x32xf32>
    %cst_136 = arith.constant 9.99999996E-13 : f32
    %324 = vector.broadcast %cst_136 : f32 to vector<16x1xf32>
    %325 = arith.addf %321, %324 : vector<16x1xf32>
    %326 = math.rsqrt %325 : vector<16x1xf32>
    %327 = vector.broadcast %326 : vector<16x1xf32> to vector<16x32xf32>
    %328 = arith.mulf %323, %327 : vector<16x32xf32>
    %329 = vector.broadcast %308 : vector<1x32xf32> to vector<16x32xf32>
    %330 = arith.mulf %328, %329 : vector<16x32xf32>
    %331 = vector.broadcast %310 : vector<1x32xf32> to vector<16x32xf32>
    %332 = arith.addf %330, %331 : vector<16x32xf32>
    %333 = arith.truncf %332 : vector<16x32xf32> to vector<16x32xbf16>
    %c0_137 = arith.constant 0 : index
    %c0_138 = arith.constant 0 : index
    %334 = vector.load %arg23[%c0_137, %c0_138] : memref<32x32xbf16, #tpu.memory_space<vmem>>, vector<32x32xbf16>
    %cst_139 = arith.constant dense<0.000000e+00> : vector<16x32xf32>
    %335 = tpu.matmul %333, %334, %cst_139 {dimension_numbers = #tpu.dot_dimension_numbers<[1], [0], [0], [1], [0, 0, 1, 1], [], []>} : vector<16x32xbf16>, vector<32x32xbf16>, vector<16x32xf32> -> vector<16x32xf32>
    %c0_140 = arith.constant 0 : index
    %c0_141 = arith.constant 0 : index
    %336 = vector.load %arg24[%c0_140, %c0_141] : memref<1x32xf32, #tpu.memory_space<vmem>>, vector<1x32xf32>
    %337 = vector.broadcast %336 : vector<1x32xf32> to vector<16x32xf32>
    %338 = arith.addf %335, %337 : vector<16x32xf32>
    %cst_142 = arith.constant 5.000000e-01 : f32
    %339 = vector.broadcast %cst_142 : f32 to vector<16x32xf32>
    %340 = arith.mulf %339, %338 : vector<16x32xf32>
    %cst_143 = arith.constant 4.471500e-02 : f32
    %341 = vector.broadcast %cst_143 : f32 to vector<16x32xf32>
    %342 = arith.mulf %341, %338 : vector<16x32xf32>
    %343 = arith.mulf %342, %338 : vector<16x32xf32>
    %344 = arith.mulf %343, %338 : vector<16x32xf32>
    %345 = arith.addf %338, %344 : vector<16x32xf32>
    %cst_144 = arith.constant 0.797884583 : f32
    %346 = vector.broadcast %cst_144 : f32 to vector<16x32xf32>
    %347 = arith.mulf %346, %345 : vector<16x32xf32>
    %348 = math.tanh %347 : vector<16x32xf32>
    %cst_145 = arith.constant 1.000000e+00 : f32
    %349 = vector.broadcast %cst_145 : f32 to vector<16x32xf32>
    %350 = arith.addf %349, %348 : vector<16x32xf32>
    %351 = arith.mulf %340, %350 : vector<16x32xf32>
    %c0_146 = arith.constant 0 : index
    %c0_147 = arith.constant 0 : index
    %352 = vector.load %arg25[%c0_146, %c0_147] : memref<1x32xf32, #tpu.memory_space<vmem>>, vector<1x32xf32>
    %c0_148 = arith.constant 0 : index
    %c0_149 = arith.constant 0 : index
    %353 = vector.load %arg26[%c0_148, %c0_149] : memref<1x32xf32, #tpu.memory_space<vmem>>, vector<1x32xf32>
    %cst_150 = arith.constant dense<0.000000e+00> : vector<16xf32>
    %354 = vector.multi_reduction <add>, %351, %cst_150 [1] : vector<16x32xf32> to vector<16xf32>
    %355 = vector.shape_cast %354 : vector<16xf32> to vector<16x1xf32>
    %cst_151 = arith.constant 3.200000e+01 : f32
    %356 = vector.broadcast %cst_151 : f32 to vector<16x1xf32>
    %357 = arith.divf %355, %356 : vector<16x1xf32>
    %358 = vector.broadcast %357 : vector<16x1xf32> to vector<16x32xf32>
    %359 = arith.subf %351, %358 : vector<16x32xf32>
    %360 = arith.mulf %359, %359 : vector<16x32xf32>
    %cst_152 = arith.constant dense<0.000000e+00> : vector<16xf32>
    %361 = vector.multi_reduction <add>, %360, %cst_152 [1] : vector<16x32xf32> to vector<16xf32>
    %362 = vector.shape_cast %361 : vector<16xf32> to vector<16x1xf32>
    %cst_153 = arith.constant 3.200000e+01 : f32
    %363 = vector.broadcast %cst_153 : f32 to vector<16x1xf32>
    %364 = arith.divf %362, %363 : vector<16x1xf32>
    %365 = vector.broadcast %357 : vector<16x1xf32> to vector<16x32xf32>
    %366 = arith.subf %351, %365 : vector<16x32xf32>
    %cst_154 = arith.constant 9.99999996E-13 : f32
    %367 = vector.broadcast %cst_154 : f32 to vector<16x1xf32>
    %368 = arith.addf %364, %367 : vector<16x1xf32>
    %369 = math.rsqrt %368 : vector<16x1xf32>
    %370 = vector.broadcast %369 : vector<16x1xf32> to vector<16x32xf32>
    %371 = arith.mulf %366, %370 : vector<16x32xf32>
    %372 = vector.broadcast %352 : vector<1x32xf32> to vector<16x32xf32>
    %373 = arith.mulf %371, %372 : vector<16x32xf32>
    %374 = vector.broadcast %353 : vector<1x32xf32> to vector<16x32xf32>
    %375 = arith.addf %373, %374 : vector<16x32xf32>
    %376 = arith.truncf %375 : vector<16x32xf32> to vector<16x32xbf16>
    %c0_155 = arith.constant 0 : index
    %c0_156 = arith.constant 0 : index
    %377 = vector.load %arg27[%c0_155, %c0_156] : memref<32x128xbf16, #tpu.memory_space<vmem>>, vector<32x128xbf16>
    %cst_157 = arith.constant dense<0.000000e+00> : vector<16x128xf32>
    %378 = tpu.matmul %376, %377, %cst_157 {dimension_numbers = #tpu.dot_dimension_numbers<[1], [0], [0], [1], [0, 0, 1, 1], [], []>} : vector<16x32xbf16>, vector<32x128xbf16>, vector<16x128xf32> -> vector<16x128xf32>
    %c0_158 = arith.constant 0 : index
    %c0_159 = arith.constant 0 : index
    %379 = vector.load %arg28[%c0_158, %c0_159] : memref<1x128xf32, #tpu.memory_space<vmem>>, vector<1x128xf32>
    %380 = vector.broadcast %379 : vector<1x128xf32> to vector<16x128xf32>
    %381 = arith.addf %378, %380 : vector<16x128xf32>
    %c0_160 = arith.constant 0 : index
    %c0_161 = arith.constant 0 : index
    %382 = vector.load %arg3[%c0_160, %c0_161] : memref<16x1xi32, #tpu.memory_space<vmem>>, vector<16x1xi32>
    %c0_162 = arith.constant 0 : index
    %c0_163 = arith.constant 0 : index
    %383 = vector.load %arg4[%c0_162, %c0_163] : memref<16x1xf32, #tpu.memory_space<vmem>>, vector<16x1xf32>
    %384 = tpu.iota {dimensions = array<i32: 1>} : vector<16x128xi32>
    %cst_164 = arith.constant dense<0xFF800000> : vector<16xf32>
    %385 = vector.multi_reduction <maximumf>, %381, %cst_164 [1] : vector<16x128xf32> to vector<16xf32>
    %386 = vector.shape_cast %385 : vector<16xf32> to vector<16x1xf32>
    %387 = vector.broadcast %386 : vector<16x1xf32> to vector<16x128xf32>
    %388 = arith.cmpf oeq, %381, %387 : vector<16x128xf32>
    %c128_i32 = arith.constant 128 : i32
    %389 = vector.broadcast %c128_i32 : i32 to vector<16x128xi32>
    %390 = arith.select %388, %384, %389 : vector<16x128xi1>, vector<16x128xi32>
    %cst_165 = arith.constant dense<2147483647> : vector<16xi32>
    %391 = vector.multi_reduction <minsi>, %390, %cst_165 [1] : vector<16x128xi32> to vector<16xi32>
    %392 = vector.shape_cast %391 : vector<16xi32> to vector<16x1xi32>
    %393 = arith.cmpi eq, %392, %382 : vector<16x1xi32>
    %394 = arith.extui %393 : vector<16x1xi1> to vector<16x1xi32>
    %395 = arith.sitofp %394 : vector<16x1xi32> to vector<16x1xf32>
    %396 = vector.broadcast %386 : vector<16x1xf32> to vector<16x128xf32>
    %397 = arith.subf %381, %396 : vector<16x128xf32>
    %398 = math.exp %397 : vector<16x128xf32>
    %cst_166 = arith.constant dense<0.000000e+00> : vector<16xf32>
    %399 = vector.multi_reduction <add>, %398, %cst_166 [1] : vector<16x128xf32> to vector<16xf32>
    %400 = vector.shape_cast %399 : vector<16xf32> to vector<16x1xf32>
    %401 = math.log %400 : vector<16x1xf32>
    %402 = arith.addf %401, %386 : vector<16x1xf32>
    %403 = vector.broadcast %382 : vector<16x1xi32> to vector<16x128xi32>
    %404 = arith.cmpi eq, %384, %403 : vector<16x128xi32>
    %cst_167 = arith.constant 0.000000e+00 : f32
    %405 = vector.broadcast %cst_167 : f32 to vector<16x128xf32>
    %406 = arith.select %404, %381, %405 : vector<16x128xi1>, vector<16x128xf32>
    %cst_168 = arith.constant dense<0.000000e+00> : vector<16xf32>
    %407 = vector.multi_reduction <add>, %406, %cst_168 [1] : vector<16x128xf32> to vector<16xf32>
    %408 = vector.shape_cast %407 : vector<16xf32> to vector<16x1xf32>
    %409 = arith.subf %402, %408 : vector<16x1xf32>
    %410 = arith.mulf %409, %383 : vector<16x1xf32>
    %411 = vector.shape_cast %410 : vector<16x1xf32> to vector<1x16x1xf32>
    %cst_169 = arith.constant dense<0.000000e+00> : vector<1xf32>
    %412 = vector.multi_reduction <add>, %411, %cst_169 [1, 2] : vector<1x16x1xf32> to vector<1xf32>
    %413 = vector.shape_cast %412 : vector<1xf32> to vector<1x1x1xf32>
    %414 = vector.extract %413[0, 0, 0] : f32 from vector<1x1x1xf32>
    %415 = vector.shape_cast %383 : vector<16x1xf32> to vector<1x16x1xf32>
    %cst_170 = arith.constant dense<0.000000e+00> : vector<1xf32>
    %416 = vector.multi_reduction <add>, %415, %cst_170 [1, 2] : vector<1x16x1xf32> to vector<1xf32>
    %417 = vector.shape_cast %416 : vector<1xf32> to vector<1x1x1xf32>
    %418 = vector.extract %417[0, 0, 0] : f32 from vector<1x1x1xf32>
    %cst_171 = arith.constant 1.000000e+00 : f32
    %419 = arith.maximumf %418, %cst_171 : f32
    %420 = arith.divf %414, %419 : f32
    %421 = vector.shape_cast %332 : vector<16x32xf32> to vector<2x8x32xf32>
    %422 = vector.extract_strided_slice %421 {offsets = [0, 0, 0], sizes = [2, 1, 32], strides = [1, 1, 1]} : vector<2x8x32xf32> to vector<2x1x32xf32>
    %423 = vector.shape_cast %422 : vector<2x1x32xf32> to vector<2x32xf32>
    %424 = arith.truncf %423 : vector<2x32xf32> to vector<2x32xbf16>
    %c0_172 = arith.constant 0 : index
    %c0_173 = arith.constant 0 : index
    %425 = vector.load %arg29[%c0_172, %c0_173] : memref<32x32xbf16, #tpu.memory_space<vmem>>, vector<32x32xbf16>
    %cst_174 = arith.constant dense<0.000000e+00> : vector<2x32xf32>
    %426 = tpu.matmul %424, %425, %cst_174 {dimension_numbers = #tpu.dot_dimension_numbers<[1], [0], [0], [1], [0, 0, 1, 1], [], []>} : vector<2x32xbf16>, vector<32x32xbf16>, vector<2x32xf32> -> vector<2x32xf32>
    %c0_175 = arith.constant 0 : index
    %c0_176 = arith.constant 0 : index
    %427 = vector.load %arg30[%c0_175, %c0_176] : memref<1x32xf32, #tpu.memory_space<vmem>>, vector<1x32xf32>
    %428 = vector.broadcast %427 : vector<1x32xf32> to vector<2x32xf32>
    %429 = arith.addf %426, %428 : vector<2x32xf32>
    %430 = math.tanh %429 : vector<2x32xf32>
    %431 = arith.truncf %430 : vector<2x32xf32> to vector<2x32xbf16>
    %c0_177 = arith.constant 0 : index
    %c0_178 = arith.constant 0 : index
    %432 = vector.load %arg31[%c0_177, %c0_178] : memref<32x2xbf16, #tpu.memory_space<vmem>>, vector<32x2xbf16>
    %cst_179 = arith.constant dense<0.000000e+00> : vector<2x2xf32>
    %433 = tpu.matmul %431, %432, %cst_179 {dimension_numbers = #tpu.dot_dimension_numbers<[1], [0], [0], [1], [0, 0, 1, 1], [], []>} : vector<2x32xbf16>, vector<32x2xbf16>, vector<2x2xf32> -> vector<2x2xf32>
    %c0_180 = arith.constant 0 : index
    %c0_181 = arith.constant 0 : index
    %434 = vector.load %arg32[%c0_180, %c0_181] : memref<1x2xf32, #tpu.memory_space<vmem>>, vector<1x2xf32>
    %435 = vector.broadcast %434 : vector<1x2xf32> to vector<2x2xf32>
    %436 = arith.addf %433, %435 : vector<2x2xf32>
    %c0_182 = arith.constant 0 : index
    %c0_183 = arith.constant 0 : index
    %437 = vector.load %arg5[%c0_182, %c0_183] : memref<2x1xi32, #tpu.memory_space<vmem>>, vector<2x1xi32>
    %438 = tpu.iota {dimensions = array<i32: 1>} : vector<2x2xi32>
    %cst_184 = arith.constant dense<0xFF800000> : vector<2xf32>
    %439 = vector.multi_reduction <maximumf>, %436, %cst_184 [1] : vector<2x2xf32> to vector<2xf32>
    %440 = vector.shape_cast %439 : vector<2xf32> to vector<2x1xf32>
    %441 = vector.broadcast %440 : vector<2x1xf32> to vector<2x2xf32>
    %442 = arith.cmpf oeq, %436, %441 : vector<2x2xf32>
    %c2_i32 = arith.constant 2 : i32
    %443 = vector.broadcast %c2_i32 : i32 to vector<2x2xi32>
    %444 = arith.select %442, %438, %443 : vector<2x2xi1>, vector<2x2xi32>
    %cst_185 = arith.constant dense<2147483647> : vector<2xi32>
    %445 = vector.multi_reduction <minsi>, %444, %cst_185 [1] : vector<2x2xi32> to vector<2xi32>
    %446 = vector.shape_cast %445 : vector<2xi32> to vector<2x1xi32>
    %447 = arith.cmpi eq, %446, %437 : vector<2x1xi32>
    %448 = arith.extui %447 : vector<2x1xi1> to vector<2x1xi32>
    %449 = arith.sitofp %448 : vector<2x1xi32> to vector<2x1xf32>
    %450 = vector.broadcast %440 : vector<2x1xf32> to vector<2x2xf32>
    %451 = arith.subf %436, %450 : vector<2x2xf32>
    %452 = math.exp %451 : vector<2x2xf32>
    %cst_186 = arith.constant dense<0.000000e+00> : vector<2xf32>
    %453 = vector.multi_reduction <add>, %452, %cst_186 [1] : vector<2x2xf32> to vector<2xf32>
    %454 = vector.shape_cast %453 : vector<2xf32> to vector<2x1xf32>
    %455 = math.log %454 : vector<2x1xf32>
    %456 = arith.addf %455, %440 : vector<2x1xf32>
    %457 = vector.broadcast %437 : vector<2x1xi32> to vector<2x2xi32>
    %458 = arith.cmpi eq, %438, %457 : vector<2x2xi32>
    %cst_187 = arith.constant 0.000000e+00 : f32
    %459 = vector.broadcast %cst_187 : f32 to vector<2x2xf32>
    %460 = arith.select %458, %436, %459 : vector<2x2xi1>, vector<2x2xf32>
    %cst_188 = arith.constant dense<0.000000e+00> : vector<2xf32>
    %461 = vector.multi_reduction <add>, %460, %cst_188 [1] : vector<2x2xf32> to vector<2xf32>
    %462 = vector.shape_cast %461 : vector<2xf32> to vector<2x1xf32>
    %463 = arith.subf %456, %462 : vector<2x1xf32>
    %464 = vector.shape_cast %463 : vector<2x1xf32> to vector<1x2x1xf32>
    %cst_189 = arith.constant dense<0.000000e+00> : vector<1xf32>
    %465 = vector.multi_reduction <add>, %464, %cst_189 [1, 2] : vector<1x2x1xf32> to vector<1xf32>
    %466 = vector.shape_cast %465 : vector<1xf32> to vector<1x1x1xf32>
    %467 = vector.extract %466[0, 0, 0] : f32 from vector<1x1x1xf32>
    %cst_190 = arith.constant 2.000000e+00 : f32
    %468 = arith.divf %467, %cst_190 : f32
    %469 = arith.addf %420, %468 : f32
    %470 = tpu.iota {dimensions = array<i32: 1>} : vector<16x128xi32>
    %471 = tpu.iota {dimensions = array<i32: 0>} : vector<16x128xi32>
    %c1_i32_191 = arith.constant 1 : i32
    %472 = vector.broadcast %c1_i32_191 : i32 to vector<16x128xi32>
    %473 = arith.addi %471, %472 : vector<16x128xi32>
    %474 = arith.cmpi eq, %470, %473 : vector<16x128xi32>
    %cst_192 = arith.constant 0.000000e+00 : f32
    %475 = vector.shape_cast %395 : vector<16x1xf32> to vector<16x1xf32>
    %476 = vector.broadcast %475 : vector<16x1xf32> to vector<16x128xf32>
    %477 = vector.broadcast %cst_192 : f32 to vector<16x128xf32>
    %478 = arith.select %474, %476, %477 : vector<16x128xi1>, vector<16x128xf32>
    %cst_193 = arith.constant dense<0.000000e+00> : vector<128xf32>
    %479 = vector.multi_reduction <add>, %478, %cst_193 [0] : vector<16x128xf32> to vector<128xf32>
    %480 = vector.shape_cast %479 : vector<128xf32> to vector<1x128xf32>
    %481 = tpu.iota {dimensions = array<i32: 1>} : vector<2x128xi32>
    %482 = tpu.iota {dimensions = array<i32: 0>} : vector<2x128xi32>
    %c1_i32_194 = arith.constant 1 : i32
    %483 = vector.broadcast %c1_i32_194 : i32 to vector<2x128xi32>
    %484 = arith.addi %482, %483 : vector<2x128xi32>
    %c16_i32 = arith.constant 16 : i32
    %485 = vector.broadcast %c16_i32 : i32 to vector<2x128xi32>
    %486 = arith.addi %484, %485 : vector<2x128xi32>
    %487 = arith.cmpi eq, %481, %486 : vector<2x128xi32>
    %cst_195 = arith.constant 0.000000e+00 : f32
    %488 = vector.shape_cast %449 : vector<2x1xf32> to vector<2x1xf32>
    %489 = vector.broadcast %488 : vector<2x1xf32> to vector<2x128xf32>
    %490 = vector.broadcast %cst_195 : f32 to vector<2x128xf32>
    %491 = arith.select %487, %489, %490 : vector<2x128xi1>, vector<2x128xf32>
    %cst_196 = arith.constant dense<0.000000e+00> : vector<128xf32>
    %492 = vector.multi_reduction <add>, %491, %cst_196 [0] : vector<2x128xf32> to vector<128xf32>
    %493 = vector.shape_cast %492 : vector<128xf32> to vector<1x128xf32>
    %494 = tpu.iota {dimensions = array<i32: 1>} : vector<1x128xi32>
    %c0_i32_197 = arith.constant 0 : i32
    %495 = vector.broadcast %c0_i32_197 : i32 to vector<1x128xi32>
    %496 = arith.cmpi eq, %494, %495 : vector<1x128xi32>
    %cst_198 = arith.constant 0.000000e+00 : f32
    %497 = vector.broadcast %469 : f32 to vector<1x128xf32>
    %498 = vector.broadcast %cst_198 : f32 to vector<1x128xf32>
    %499 = arith.select %496, %497, %498 : vector<1x128xi1>, vector<1x128xf32>
    %500 = arith.addf %499, %480 : vector<1x128xf32>
    %501 = arith.addf %500, %493 : vector<1x128xf32>
    %c0_199 = arith.constant 0 : index
    %c0_200 = arith.constant 0 : index
    %502 = vector.load %arg33[%c0_199, %c0_200] : memref<1x128xf32, #tpu.memory_space<vmem>>, vector<1x128xf32>
    tpu.vector_store %arg33[%c0_199, %c0_200], %501 {strides = array<i32>} : memref<1x128xf32, #tpu.memory_space<vmem>>, vector<1x128xf32>,
    return
  }
}

</mosaic_0001>

<bundles_post_ra>
// kernel: bert_pretraining_with_loss.1
= control target key start
LH: loop header
LB: loop body
LE: loop exit
PB: predicated region body
PF: predicated region fallthrough
CT: control target
= control target key end

     0   :  { %v3316_v0 = vmov 0   ;;  %s3317_s3 = smov 1   ;;  %v3318_v1 = vmov 0.0   ;;  %s3319_s7 = smov 6   ;;  %vm3320_vm0 = vmmov 0   ;;  %v139_v16 = vlaneseq  ;;  %s3876_s0 = inlined_call_operand.smem [shape: u32[34], index: -1, kind: input, shape index: {}] }
   0x1   :  { %3169 = vset.pattern.permute.xlu0 %v3316_v0  ;;  %s2662_s6 = sld [smem:[%s3876_s0 + %s3317_s3]]   ;;  %2899 = vmatprep.subr.bf16.mxu0 %v3318_v1  ;;  %s3321_s11 = smov 2   ;;  %v3322_v20 = vmov 1.0|1.0   ;;  %vm292_vm8 = vcmask 261120   ;;  %vm455_vm9 = vcmask 130048   ;;  %vm683_vm10 = vcmask 1043456  }
   0x2   :  { %s3370_s10 = sld [smem:[%s3876_s0 + %s3319_s7]]   ;;  %3170 = vset.pattern.permute.xlu1 %v3316_v0  ;;  %2919 = vmatprep.subr.bf16.mxu1 %v3318_v1  ;;  %v3396_v18 = vand.u32 127, %v139_v16  ;;  %s3323_s15 = smov 7   ;;  %v3405_v21 = vshrl.u32 %v139_v16, 7  ;;  %vm649_vm12 = vcmask 64512   ;;  %vm1141_vm13 = vcmask 523264  }
   0x3   :  { %2915 = vmatprep.mubr.msk.bf16.mxu0 %vm3320_vm0, %v3318_v1  ;;  %2923 = vmatprep.mubr.msk.bf16.mxu1 %vm3320_vm0, %v3318_v1  ;;  %s2663_s14 = sld [smem:[%s3876_s0 + %s3321_s11]]   ;;  %s3324_s19 = smov 8   ;;  %vm2426_vm14 = vcmask 1041409   ;;  %vm2553_vm15 = vcmask 9216  }
   0x4   :  { %s2668_s18 = sld [smem:[%s3876_s0 + %s3323_s15]]   ;;  %v189_v23 = vsub.s32 1, %v3405_v21  ;;  %v3409_v24 = vsub.s32 0, %v3405_v21  ;;  %s3325_s23 = smov 11  }
   0x5   :  { %s2669_s22 = sld [smem:[%s3876_s0 + %s3324_s19]]   ;;  %s3326_s27 = smov 9  }
   0x6   :  { %s3422_s26 = sld [smem:[%s3876_s0 + %s3325_s23]]   ;;  %s3327_s1 = smov 10  }
   0x7   :  { %v141_v2 = vld [vmem:[%s2662_s6] sm:$0xff]  ;;  %v142_v4 = vld [vmem:[%s2662_s6 + $0x8] sm:$0xff]  ;;  %s2670_s30 = sld [smem:[%s3876_s0 + %s3326_s27]]   ;;  %s3328_s5 = smov 12  }
   0x8   :  { %144 = vperm.xlu0 %3169, %v141_v2   ;;  %v3196_v3 = vld [vmem:[%s3370_s10] sm:$0xff]   ;;  %v3197_v5 = vld [vmem:[%s3370_s10 + $0x8] sm:$0xff]   ;;  %v3198_v6 = vld [vmem:[%s3370_s10 + $0x10] sm:$0xff]   ;;  %s2671_s4 = sld [smem:[%s3876_s0 + %s3327_s1]]   ;;  %s3329_s9 = smov 96  }
   0x9   :  { %2900 = vmatpush3.bf16.msra.mxu0 %v3196_v3  ;;  %v3199_v7 = vld [vmem:[%s3370_s10 + $0x18] sm:$0xff]   ;;  %v173_v8 = vld [vmem:[%s2663_s14] sm:$0xff]  ;;  %v174_v9 = vld [vmem:[%s2663_s14 + $0x8] sm:$0xff]  ;;  %s3446_s8 = sld [smem:[%s3876_s0 + %s3328_s5]]   ;;  %s3331_s11 = smov 64  }
   0xa   :  { %2901 = vmatprep.subr.bf16.mxu0 %v3318_v1  ;;  %v3200_v10 = vld [vmem:[%s3370_s10 + $0x20] sm:$0xff]   ;;  %vm175_vm1 = vcmp.eq.s32.totalorder %v173_v8, 1  ;;  %vm176_vm2 = vcmp.eq.s32.totalorder %v174_v9, 1  ;;  %v3201_v13 = vld [vmem:[%s3370_s10 + $0x28] sm:$0xff]   ;;  %v3202_v14 = vld [vmem:[%s3370_s10 + $0x30] sm:$0xff]   ;;  %s1_s14 = sld [smem:[%s3876_s0]]   ;;  %s3333_s15 = smov 13  }
   0xb   :  { %v177_v11 = vsel %vm175_vm1, 1, %v3316_v0  ;;  %v178_v12 = vsel %vm176_vm2, 1, %v3316_v0  ;;  %v3203_v15 = vld [vmem:[%s3370_s10 + $0x38] sm:$0xff]   ;;  %v172_v25 = vld [vmem:[%s2668_s18] sm:$0x3]  ;;  %v287_v36 = vld [vmem:[%s2669_s22 + $0x8] sm:$0xff]  ;;  %s3534_s18 = sld [smem:[%s3876_s0 + %s3333_s15]]  }
   0xc   :  { %147 = vperm.xlu0 %3169, %v142_v4   ;;  %180 = vperm.xlu1 %3170, %v177_v11   ;;  %v190_v26 = vrot.slane %v172_v25, %v189_v23  ;;  %v194_v27 = vrot.slane %v172_v25, %v3409_v24  ;;  %v286_v31 = vld [vmem:[%s2669_s22] sm:$0xff]  ;;  %v3205_v54 = vld [vmem:[%s3422_s26 + $0x8] sm:$0xff]   ;;  %s3330_s10 = smov 112   ;;  %s3334_s19 = smov 16  }
   0xd   :  { %2902 = vmatpush3.bf16.msra.mxu0 %v3197_v5  ;;  %v3204_v53 = vld [vmem:[%s3422_s26] sm:$0xff]   ;;  %s3335_s20 = smov 14   ;;  %s3336_s24 = smov 17  }
   0xe   :  { %2903 = vmatprep.subr.bf16.mxu0 %v3318_v1  ;;  %2920 = vmatpush3.bf16.msra.mxu1 %v3204_v53  ;;  %v2707_v63 = vld [vmem:[%s2670_s30] ss:$0 sm:$0xff]  ;;  %s3549_s23 = sld [smem:[%s3876_s0 + %s3335_s20]]   ;;  %s3337_s29 = smov 15  }
   0xf   :  { %2921 = vmatprep.subr.bf16.mxu1 %v3318_v1  ;;  %v2708_v4 = vld [vmem:[%s2671_s4] ss:$0 sm:$0xff]  ;;  %s3561_s28 = sld [smem:[%s3876_s0 + %s3336_s24]]   ;;  %s3338_s6 = smov 19  }
  0x10   :  { %183 = vperm.xlu1 %3170, %v178_v12   ;;  %v2709_v9 = vld [vmem:[%s3446_s8] ss:$0 sm:$0xff]  ;;  %s3570_s2 = sld [smem:[%s3876_s0 + %s3337_s29]]   ;;  %s3340_s20 = smov 20  }
  0x11   :  { %2904 = vmatpush3.bf16.msra.mxu0 %v3198_v6  ;;  %s3576_s5 = sld [smem:[%s3876_s0 + %s3334_s19]]   ;;  %s3341_s25 = smov 21  }
  0x12   :  { %2905 = vmatprep.subr.bf16.mxu0 %v3318_v1  ;;  %2922 = vmatpush3.bf16.msra.mxu1 %v3205_v54  ;;  %s3586_s13 = sld [smem:[%s3876_s0 + %s3338_s6]]   ;;  %s3346_s12 = smov 24  }
  0x13   :  { %2927 = vmatprep.subr.bf16.mxu1 %v3318_v1  ;;  %s3608_s24 = sld [smem:[%s3876_s0 + %s3340_s20]]   ;;  %s3347_s16 = smov 27  }
  0x14   :  { %s3622_s30 = sld [smem:[%s3876_s0 + %s3341_s25]]   ;;  %s3348_s22 = smov 31  }
  0x15   :  { %2906 = vmatpush3.bf16.msra.mxu0 %v3199_v7  ;;  %s2685_s15 = sld [smem:[%s3876_s0 + %s3346_s12]]   ;;  %s3349_s29 = smov 30  }
  0x16   :  { %2907 = vmatprep.subr.bf16.mxu0 %v3318_v1  ;;  %s2688_s21 = sld [smem:[%s3876_s0 + %s3347_s16]]   ;;  %s3350_s3 = smov 25  }
  0x17   :  { %s3785_s27 = sld [smem:[%s3876_s0 + %s3348_s22]]   ;;  %s3355_s20 = smov 4  }
  0x18   :  { %s2691_s1 = sld [smem:[%s3876_s0 + %s3349_s29]]   ;;  %s3356_s29 = smov 1.0  }
  0x19   :  { %2908 = vmatpush3.bf16.msra.mxu0 %v3200_v10 }
  0x1a   :  { %2909 = vmatprep.subr.bf16.mxu0 %v3318_v1 }
  0x1d   :  { %2910 = vmatpush3.bf16.msra.mxu0 %v3201_v13 }
  0x1e   :  { %2911 = vmatprep.subr.bf16.mxu0 %v3318_v1 }
  0x21   :  { %2912 = vmatpush3.bf16.msra.mxu0 %v3202_v14 }
  0x22   :  { %2913 = vmatprep.subr.bf16.mxu0 %v3318_v1 }
  0x25   :  { %2914 = vmatpush3.bf16.msra.mxu0 %v3203_v15 }
  0x26   :  { %2945 = vmatprep.subr.bf16.mxu0 %v3318_v1 }
  0x87   :  { %v145_v17 = vpop.permute.xlu0 %144 }
  0x88   :  { %vm149_vm3 = vcmp.eq.s32.totalorder %v3396_v18, %v145_v17 }
  0x8b   :  { %v148_v19 = vpop.permute.xlu0 %147  ;;  %v181_v22 = vpop.permute.xlu1 %180 }
  0x8c   :  { %vm150_vm4 = vcmp.eq.s32.totalorder %v3396_v18, %v148_v19  ;;  %vm185_vm6 = vcmp.eq.s32.totalorder %v181_v22, 1 }
  0x8d   :  { %vm2705_vm5 = vmpackc.low %vm150_vm4, %vm149_vm3  ;;  %v195_v29 = vsel %vm185_vm6, %v190_v26, %v194_v27  ;;  %vm2378_vm6 = vcmask 7168  }
  0x8e   :  { %2916 = vmatmul.mubr.msk.bf16.vlgmr.msra.gmra.mrb[0].mxu0 %vm2705_vm5, %v3322_v20 }
  0x8f   :  { %2947 = vmatprep.mubr.msk.bf16.mxu0 %vm3320_vm0, %v3318_v1  ;;  %v184_v28 = vpop.permute.xlu1 %183 }
  0x90   :  { %vm186_vm7 = vcmp.eq.s32.totalorder %v184_v28, 1 }
  0x91   :  { %v196_v34 = vsel %vm186_vm7, %v190_v26, %v194_v27 }
 0x161   :  { %v279_v30 = vpop.f32.mrb[0].mxu0 }
 0x162   :  { %v280_v32 = vadd.f32 %v279_v30, %v195_v29  ;;  %v2917_v33 = vpop.f32.mrb[1].mxu0 }
 0x163   :  { %v282_v35 = vpop.f32.mrb[2].mxu0 }
 0x164   :  { %v283_v37 = vadd.f32 %v282_v35, %v196_v34  ;;  %v2918_v38 = vpop.f32.mrb[3].mxu0  ;;  %v288_v39 = vadd.f32 %v286_v31, %v280_v32 }
 0x166   :  { %v293_v40 = vsel %vm292_vm8, %v288_v39, 0.0  ;;  %v289_v41 = vadd.f32 %v287_v36, %v283_v37 }
 0x167   :  { %294 = vadd.xlane.f32.xlu0 %v293_v40 }
 0x168   :  { %v296_v42 = vsel %vm292_vm8, %v289_v41, 0.0 }
 0x169   :  { %297 = vadd.xlane.f32.xlu1 %v296_v42 }
 0x1f4   :  { %v295_v43 = vpop.xlane.xlu0 %294 }
 0x1f5   :  { %v300_v44 = vmul.f32 0.03125, %v295_v43 }
 0x1f6   :  { %v298_v45 = vpop.xlane.xlu1 %297 }
 0x1f7   :  { %v302_v46 = vsub.f32 %v288_v39, %v300_v44  ;;  %v301_v47 = vmul.f32 0.03125, %v298_v45  ;;  %v3332_v39 = vmov 1966171168  }
 0x1f8   :  { %v342_v40 = vunpack.c.l.s4 %v3332_v39 }
 0x1f9   :  { %v303_v48 = vsub.f32 %v289_v41, %v301_v47  ;;  %v304_v49 = vmul.f32 %v302_v46, %v302_v46  ;;  %v337_v41 = vld [vmem:[%s1_s14] sm:$0x3]  ;;  %s3339_s14 = smov 18  }
 0x1fa   :  { %v343_v42 = vunpack.c.0.s8 %v342_v40  ;;  %vm338_vm11 = vcmp.eq.s32.totalorder %v337_v41, 0  ;;  %s3599_s17 = sld [smem:[%s3876_s0 + %s3339_s14]]  }
 0x1fb   :  { %v306_v50 = vsel %vm292_vm8, %v304_v49, 0.0  ;;  %v305_v51 = vmul.f32 %v303_v48, %v303_v48  ;;  %v339_v44 = vsel %vm338_vm11, -10000.0, %v3318_v1 }
 0x1fc   :  { %307 = vadd.xlane.f32.xlu0 %v306_v50  ;;  %v346_v43 = vsub.s32 %v343_v42, %v3405_v21 }
 0x1fd   :  { %v309_v52 = vsel %vm292_vm8, %v305_v51, 0.0 }
 0x1fe   :  { %v347_v45 = vrot.slane %v339_v44, %v346_v43 }
 0x200   :  { %310 = vadd.xlane.f32.xlu0 %v309_v52 }
 0x289   :  { %v308_v55 = vpop.xlane.xlu0 %307 }
 0x28a   :  { %v312_v56 = vmul.f32 0.03125, %v308_v55 }
 0x28c   :  { %v314_v57 = vadd.f32 1e-12, %v312_v56 }
 0x28d   :  { %v311_v58 = vpop.xlane.xlu0 %310 }
 0x28e   :  { %3232 = vrsqrt.f32 %v314_v57  ;;  %v313_v59 = vmul.f32 0.03125, %v311_v58 }
 0x290   :  { %v315_v60 = vadd.f32 1e-12, %v313_v59 }
 0x292   :  { %3234 = vrsqrt.f32 %v315_v60 }
 0x298   :  { %v3233_v61 = vpop.eup %3232 }
 0x299   :  { %v318_v62 = vmul.f32 %v3233_v61, %v302_v46  ;;  %v355_v46 = vrot.slane %v347_v45, %v346_v43 }
 0x29b   :  { %v326_v3 = vmul.f32 %v2707_v63, %v318_v62  ;;  %v3494_v47 = vrot.slane %v355_v46, %v3409_v24 }
 0x29c   :  { %v3235_v0 = vpop.eup %3234 }
 0x29d   :  { %v319_v2 = vmul.f32 %v3235_v0, %v303_v48  ;;  %v3434_v6 = vadd.f32 %v2708_v4, %v326_v3  ;;  %v348_v48 = vcombine.high %v347_v45, %v347_v45 }
 0x29f   :  { %v327_v5 = vmul.f32 %v2707_v63, %v319_v2  ;;  %v362_v52 = vrot.slane %v348_v48, %v346_v43 }
 0x2a1   :  { %v3436_v7 = vadd.f32 %v2708_v4, %v327_v5  ;;  %v3499_v56 = vrot.slane %v362_v52, %v3409_v24 }
 0x2a3   :  { %v336_v8 = vpack.c.bf16 %v3436_v7, %v3434_v6 }
 0x2a5   :  { %2924 = vmatmul.mubr.msk.bf16.vlgmr.msra.gmra.mrb[0].mxu1 %vm292_vm8, %v336_v8 }
 0x2a6   :  { %2929 = vmatprep.mubr.msk.bf16.mxu1 %vm3320_vm0, %v3318_v1 }
 0x378   :  { %v423_v10 = vpop.f32.mrb[0].mxu1 }
 0x379   :  { %v424_v11 = vadd.f32 %v2709_v9, %v423_v10  ;;  %v2925_v12 = vpop.f32.mrb[1].mxu1 }
 0x37a   :  { %v426_v13 = vpop.f32.mrb[2].mxu1 }
 0x37b   :  { %v438_v14 = vpack.c.bf16 %v424_v11, %v424_v11  ;;  %v427_v15 = vadd.f32 %v2709_v9, %v426_v13  ;;  %v2926_v16 = vpop.f32.mrb[3].mxu1 }
 0x37d   :  { %v3171_v17 = vpack.i.bf16 %v427_v15, %v424_v11  ;;  %453 = vrot.lane.b32.xlu0 %v438_v14, %s3329_s9  ;;  %v439_v19 = vpack.c.bf16 %v427_v15, %v427_v15 }
 0x37f   :  { %3172 = vrot.lane.b32.xlu1 %v3171_v17, %s3330_s10 }
 0x383   :  { %503 = vrot.lane.b32.xlu1 %v439_v19, %s3329_s9 }
 0x3ef   :  { %v454_v20 = vpop.permute.xlu0 %453 }
 0x3f0   :  { %v460_v22 = vsel %vm455_vm9, %v454_v20, 0 }
 0x3f1   :  { %2928 = vmatpush3.bf16.xpose.msra.mxu1 %v460_v22  ;;  %v3173_v23 = vpop.permute.xlu1 %3172 }
 0x3f2   :  { %v3175_v25 = vunpack.i.h.bf16 %v3173_v23  ;;  %v3174_v26 = vunpack.i.l.bf16 %v3173_v23  ;;  %2933 = vmatprep.subr.bf16.mxu1 %v3318_v1 }
 0x3f4   :  { %v3454_v27 = vpack.c.bf16 %v3175_v25, %v3175_v25  ;;  %v3456_v28 = vpack.c.bf16 %v3174_v26, %v3174_v26 }
 0x3f5   :  { %v504_v29 = vpop.permute.xlu1 %503 }
 0x3f6   :  { %601 = vrot.lane.b32.xlu0 %v3454_v27, %s3329_s9  ;;  %552 = vrot.lane.b32.xlu1 %v3456_v28, %s3329_s9  ;;  %v509_v30 = vsel %vm455_vm9, %v504_v29, 0 }
 0x3f8   :  { %2930 = vmatmul.mubr.msk.bf16.vlgmr.msra.gmra.mrb[4].mxu1 %vm455_vm9, %v438_v14 }
 0x3f9   :  { %2934 = vmatpush3.bf16.xpose.msra.mxu1 %v509_v30  ;;  %2935 = vmatprep.mubr.msk.bf16.mxu1 %vm3320_vm0, %v3318_v1 }
 0x3fa   :  { %678 = vrot.lane.b32.xlu0 %v438_v14, %s3331_s11  ;;  %727 = vrot.lane.b32.xlu1 %v439_v19, %s3331_s11 }
 0x3fb   :  { %2939 = vmatprep.subr.bf16.mxu1 %v3318_v1 }
 0x400   :  { %2936 = vmatmul.mubr.msk.bf16.vlgmr.msra.gmra.mrb[8].mxu1 %vm455_vm9, %v439_v19 }
 0x401   :  { %2941 = vmatprep.mubr.msk.bf16.mxu1 %vm3320_vm0, %v3318_v1 }
 0x468   :  { %v602_v31 = vpop.permute.xlu0 %601  ;;  %v553_v32 = vpop.permute.xlu1 %552 }
 0x469   :  { %v607_v33 = vsel %vm455_vm9, %v602_v31, 0  ;;  %v558_v34 = vsel %vm455_vm9, %v553_v32, 0 }
 0x46a   :  { %2940 = vmatpush3.bf16.xpose.msra.mxu1 %v558_v34  ;;  %2946 = vmatpush3.bf16.xpose.msra.mxu0 %v607_v33 }
 0x46b   :  { %2951 = vmatprep.subr.bf16.mxu1 %v3318_v1  ;;  %2957 = vmatprep.subr.bf16.mxu0 %v3318_v1 }
 0x46c   :  { %v679_v35 = vpop.permute.xlu0 %678  ;;  %v728_v36 = vpop.permute.xlu1 %727 }
 0x46d   :  { %v685_v37 = vsel %vm683_vm10, %v679_v35, 0  ;;  %v733_v38 = vsel %vm683_vm10, %v728_v36, 0 }
 0x471   :  { %2942 = vmatmul.mubr.msk.bf16.vlgmr.msra.gmra.mrb[12].mxu1 %vm455_vm9, %v3456_v28  ;;  %2948 = vmatmul.mubr.msk.bf16.vlgmr.msra.gmra.mrb[4].mxu0 %vm455_vm9, %v3454_v27 }
 0x472   :  { %2952 = vmatpush3.bf16.msra.mxu1 %v685_v37  ;;  %2958 = vmatpush3.bf16.msra.mxu0 %v733_v38 }
 0x473   :  { %2953 = vmatprep.mubr.msk.bf16.mxu1 %vm3320_vm0, %v3318_v1  ;;  %2959 = vmatprep.mubr.msk.bf16.mxu0 %vm3320_vm0, %v3318_v1 }
 0x474   :  { %2963 = vmatprep.subr.bf16.mxu1 %v3318_v1  ;;  %2969 = vmatprep.subr.bf16.mxu0 %v3318_v1 }
 0x4cb   :  { %v496_v49 = vpop.f32.mrb[4].mxu1 }
 0x4cc   :  { %v497_v50 = vadd.f32 %v496_v49, %v3494_v47  ;;  %v2931_v51 = vpop.f32.mrb[5].mxu1  ;;  %v3206_v49 = vld [vmem:[%s3534_s18] sm:$0xff]  }
 0x4cd   :  { %v499_v53 = vpop.f32.mrb[6].mxu1 }
 0x4ce   :  { %v2932_v54 = vpop.f32.mrb[7].mxu1  ;;  %v650_v55 = vsel %vm649_vm12, %v497_v50, -inf }
 0x4cf   :  { %651 = vmax.xlane.f32.xlu1 %v650_v55 }
 0x4d3   :  { %v545_v57 = vpop.f32.mrb[8].mxu1 }
 0x4d4   :  { %v546_v58 = vadd.f32 %v545_v57, %v3499_v56  ;;  %v2937_v59 = vpop.f32.mrb[9].mxu1  ;;  %v3207_v57 = vld [vmem:[%s3534_s18 + $0x8] sm:$0xff]  }
 0x4d5   :  { %v548_v60 = vpop.f32.mrb[10].mxu1 }
 0x4d6   :  { %v2938_v61 = vpop.f32.mrb[11].mxu1  ;;  %v653_v62 = vsel %vm649_vm12, %v546_v58, -inf }
 0x4d7   :  { %654 = vmax.xlane.f32.xlu0 %v653_v62 }
 0x544   :  { %v594_v63 = vpop.f32.mrb[12].mxu1  ;;  %v643_v0 = vpop.f32.mrb[4].mxu0 }
 0x545   :  { %v595_v2 = vadd.f32 %v594_v63, %v3494_v47  ;;  %v644_v3 = vadd.f32 %v643_v0, %v3499_v56  ;;  %v2943_v4 = vpop.f32.mrb[13].mxu1  ;;  %v2949_v5 = vpop.f32.mrb[5].mxu0 }
 0x546   :  { %v597_v8 = vpop.f32.mrb[14].mxu1  ;;  %v646_v24 = vpop.f32.mrb[6].mxu0 }
 0x547   :  { %v2944_v9 = vpop.f32.mrb[15].mxu1  ;;  %v2950_v10 = vpop.f32.mrb[7].mxu0  ;;  %v659_v11 = vsel %vm649_vm12, %v644_v3, -inf  ;;  %v656_v12 = vsel %vm649_vm12, %v595_v2, -inf }
 0x548   :  { %660 = vmax.xlane.f32.xlu1 %v659_v11  ;;  %657 = vmax.xlane.f32.xlu0 %v656_v12 }
 0x559   :  { %775 = vrot.lane.b32.xlu1 %v3456_v28, %s3331_s11 }
 0x55c   :  { %v652_v13 = vpop.xlane.xlu1 %651 }
 0x55d   :  { %v662_v14 = vsub.f32 %v497_v50, %v652_v13 }
 0x55e   :  { %823 = vrot.lane.b32.xlu0 %v3454_v27, %s3331_s11 }
 0x55f   :  { %v666_v15 = vmul.f32 1.442695, %v662_v14 }
 0x561   :  { %3236 = vpow2.f32 %v666_v15 }
 0x564   :  { %v655_v16 = vpop.xlane.xlu0 %654 }
 0x565   :  { %v663_v17 = vsub.f32 %v546_v58, %v655_v16 }
 0x567   :  { %v668_v19 = vmul.f32 1.442695, %v663_v17 }
 0x569   :  { %3238 = vpow2.f32 %v668_v19 }
 0x56b   :  { %v3237_v20 = vpop.eup %3236 }
 0x56c   :  { %v674_v22 = vpack.c.bf16 %v3237_v20, %v3237_v20  ;;  %v871_v42 = vsel %vm649_vm12, %v3237_v20, 0.0 }
 0x56e   :  { %2954 = vmatmul.mubr.msk.bf16.vlgmr.msra.gmra.mrb[16].mxu1 %vm649_vm12, %v674_v22 }
 0x56f   :  { %2965 = vmatprep.mubr.msk.bf16.mxu1 %vm3320_vm0, %v3318_v1 }
 0x573   :  { %v3239_v23 = vpop.eup %3238 }
 0x574   :  { %v675_v25 = vpack.c.bf16 %v3239_v23, %v3239_v23  ;;  %v874_v43 = vsel %vm649_vm12, %v3239_v23, 0.0  ;;  %v2721_v23 = vld [vmem:[%s3549_s23] ss:$0 sm:$0xff] }
 0x576   :  { %2960 = vmatmul.mubr.msk.bf16.vlgmr.msra.gmra.mrb[8].mxu0 %vm649_vm12, %v675_v25 }
 0x577   :  { %2971 = vmatprep.mubr.msk.bf16.mxu0 %vm3320_vm0, %v3318_v1 }
 0x5d5   :  { %v661_v26 = vpop.xlane.xlu1 %660  ;;  %v658_v27 = vpop.xlane.xlu0 %657 }
 0x5d6   :  { %v665_v28 = vsub.f32 %v644_v3, %v661_v26  ;;  %v664_v29 = vsub.f32 %v595_v2, %v658_v27 }
 0x5d8   :  { %v672_v30 = vmul.f32 1.442695, %v665_v28  ;;  %v670_v31 = vmul.f32 1.442695, %v664_v29 }
 0x5d9   :  { %v776_v32 = vpop.permute.xlu1 %775  ;;  %v824_v33 = vpop.permute.xlu0 %823 }
 0x5da   :  { %3240 = vpow2.f32 %v672_v30  ;;  %v781_v34 = vsel %vm683_vm10, %v776_v32, 0  ;;  %v829_v35 = vsel %vm683_vm10, %v824_v33, 0 }
 0x5db   :  { %3242 = vpow2.f32 %v670_v31  ;;  %2964 = vmatpush3.bf16.msra.mxu1 %v781_v34  ;;  %2970 = vmatpush3.bf16.msra.mxu0 %v829_v35 }
 0x5dc   :  { %2975 = vmatprep.subr.bf16.mxu1 %v3318_v1  ;;  %2983 = vmatprep.subr.bf16.mxu0 %v3318_v1 }
 0x5e4   :  { %v3241_v36 = vpop.eup %3240 }
 0x5e5   :  { %v3243_v37 = vpop.eup %3242  ;;  %v880_v38 = vsel %vm649_vm12, %v3241_v36, 0.0  ;;  %v677_v39 = vpack.c.bf16 %v3241_v36, %v3241_v36 }
 0x5e6   :  { %881 = vadd.xlane.f32.xlu0 %v880_v38  ;;  %v877_v40 = vsel %vm649_vm12, %v3243_v37, 0.0  ;;  %v676_v41 = vpack.c.bf16 %v3243_v37, %v3243_v37 }
 0x5e7   :  { %878 = vadd.xlane.f32.xlu1 %v877_v40  ;;  %2972 = vmatmul.mubr.msk.bf16.vlgmr.msra.gmra.mrb[12].mxu0 %vm649_vm12, %v677_v39 }
 0x5e8   :  { %2966 = vmatmul.mubr.msk.bf16.vlgmr.msra.gmra.mrb[20].mxu1 %vm649_vm12, %v676_v41  ;;  %2987 = vmatprep.mubr.msk.bf16.mxu0 %vm3320_vm0, %v3318_v1 }
 0x5e9   :  { %2979 = vmatprep.mubr.msk.bf16.mxu1 %vm3320_vm0, %v3318_v1  ;;  %2976 = vmatpush3.bf16.msra.mxu1 %v3206_v49 }
 0x5ea   :  { %872 = vadd.xlane.f32.xlu0 %v871_v42  ;;  %2977 = vmatprep.subr.bf16.mxu1 %v3318_v1 }
 0x5eb   :  { %875 = vadd.xlane.f32.xlu1 %v874_v43 }
 0x5ed   :  { %2978 = vmatpush3.bf16.msra.mxu1 %v3207_v57 }
 0x5ee   :  { %2991 = vmatprep.subr.bf16.mxu1 %v3318_v1 }
 0x641   :  { %v721_v44 = vpop.f32.mrb[16].mxu1 }
 0x642   :  { %v2955_v45 = vpop.f32.mrb[17].mxu1 }
 0x643   :  { %v724_v46 = vpop.f32.mrb[18].mxu1 }
 0x644   :  { %v2956_v48 = vpop.f32.mrb[19].mxu1 }
 0x649   :  { %v769_v50 = vpop.f32.mrb[8].mxu0 }
 0x64a   :  { %v2961_v51 = vpop.f32.mrb[9].mxu0 }
 0x64b   :  { %v772_v52 = vpop.f32.mrb[10].mxu0 }
 0x64c   :  { %v2962_v53 = vpop.f32.mrb[11].mxu0 }
 0x673   :  { %v882_v54 = vpop.xlane.xlu0 %881 }
 0x674   :  { %v879_v55 = vpop.xlane.xlu1 %878  ;;  %3244 = vrcp.f32 %v882_v54  ;;  %v2725_v54 = vld [vmem:[%s3570_s2] ss:$0 sm:$0xff] }
 0x675   :  { %3246 = vrcp.f32 %v879_v55 }
 0x677   :  { %v873_v9 = vpop.xlane.xlu0 %872 }
 0x678   :  { %v876_v10 = vpop.xlane.xlu1 %875  ;;  %3248 = vrcp.f32 %v873_v9 }
 0x679   :  { %3250 = vrcp.f32 %v876_v10 }
 0x67e   :  { %v3245_v58 = vpop.eup %3244 }
 0x67f   :  { %v3247_v60 = vpop.eup %3246 }
 0x682   :  { %v3249_v11 = vpop.eup %3248 }
 0x683   :  { %v3251_v12 = vpop.eup %3250  ;;  %v887_v14 = vmul.f32 %v3249_v11, %v721_v44  ;;  %v3209_v44 = vld [vmem:[%s3561_s28 + $0x8] sm:$0xff]  }
 0x684   :  { %v888_v15 = vmul.f32 %v3251_v12, %v769_v50 }
 0x6ba   :  { %v865_v59 = vpop.f32.mrb[12].mxu0 }
 0x6bb   :  { %v817_v61 = vpop.f32.mrb[20].mxu1  ;;  %v890_v62 = vmul.f32 %v3245_v58, %v865_v59  ;;  %v2973_v63 = vpop.f32.mrb[13].mxu0  ;;  %v2726_v59 = vld [vmem:[%s3576_s5] ss:$0 sm:$0xff] }
 0x6bc   :  { %v889_v0 = vmul.f32 %v3247_v60, %v817_v61  ;;  %v2967_v2 = vpop.f32.mrb[21].mxu1  ;;  %v868_v3 = vpop.f32.mrb[14].mxu0 }
 0x6bd   :  { %v820_v4 = vpop.f32.mrb[22].mxu1  ;;  %v2974_v5 = vpop.f32.mrb[15].mxu0  ;;  %v3211_v2 = vld [vmem:[%s3586_s13 + $0x8] sm:$0xff]   ;;  %v3212_v3 = vld [vmem:[%s3586_s13 + $0x10] sm:$0xff]  }
 0x6be   :  { %v3176_v8 = vpack.i.bf16 %v890_v62, %v889_v0  ;;  %v2968_v24 = vpop.f32.mrb[23].mxu1  ;;  %v3210_v0 = vld [vmem:[%s3586_s13] sm:$0xff]   ;;  %v3213_v4 = vld [vmem:[%s3586_s13 + $0x18] sm:$0xff]  }
 0x6bf   :  { %v2727_v5 = vld [vmem:[%s3599_s17] ss:$0 sm:$0xff] }
 0x6c0   :  { %3177 = vrot.lane.b32.xlu0 %v3176_v8, %s3334_s19 }
 0x732   :  { %v3178_v13 = vpop.permute.xlu0 %3177 }
 0x733   :  { %v3180_v16 = vunpack.i.h.bf16 %v3178_v13  ;;  %v3179_v17 = vunpack.i.l.bf16 %v3178_v13 }
 0x735   :  { %v900_v19 = vsel %vm455_vm9, %v888_v15, %v3180_v16  ;;  %v899_v20 = vsel %vm455_vm9, %v887_v14, %v3179_v17 }
 0x736   :  { %v901_v22 = vpack.c.bf16 %v900_v19, %v899_v20 }
 0x738   :  { %2980 = vmatmul.mubr.msk.bf16.vlgmr.msra.gmra.mrb[24].mxu1 %vm292_vm8, %v901_v22 }
 0x739   :  { %2999 = vmatprep.mubr.msk.bf16.mxu1 %vm3320_vm0, %v3318_v1  ;;  %2992 = vmatpush3.bf16.msra.mxu1 %v3210_v0 }
 0x73a   :  { %2993 = vmatprep.subr.bf16.mxu1 %v3318_v1 }
 0x73d   :  { %2994 = vmatpush3.bf16.msra.mxu1 %v3211_v2 }
 0x73e   :  { %2995 = vmatprep.subr.bf16.mxu1 %v3318_v1 }
 0x741   :  { %2996 = vmatpush3.bf16.msra.mxu1 %v3212_v3  ;;  %v2737_v3 = vld [vmem:[%s3622_s30] ss:$0 sm:$0xff] }
 0x742   :  { %2997 = vmatprep.subr.bf16.mxu1 %v3318_v1 }
 0x745   :  { %2998 = vmatpush3.bf16.msra.mxu1 %v3213_v4 }
 0x746   :  { %3017 = vmatprep.subr.bf16.mxu1 %v3318_v1 }
 0x80b   :  { %v962_v25 = vpop.f32.mrb[24].mxu1 }
 0x80c   :  { %v963_v26 = vadd.f32 %v2721_v23, %v962_v25  ;;  %v2981_v27 = vpop.f32.mrb[25].mxu1 }
 0x80d   :  { %v965_v28 = vpop.f32.mrb[26].mxu1 }
 0x80e   :  { %v966_v29 = vadd.f32 %v2721_v23, %v965_v28  ;;  %v2982_v30 = vpop.f32.mrb[27].mxu1  ;;  %v969_v31 = vadd.f32 %v963_v26, %v3434_v6 }
 0x810   :  { %v973_v32 = vsel %vm292_vm8, %v969_v31, 0.0  ;;  %v970_v33 = vadd.f32 %v966_v29, %v3436_v7  ;;  %v3208_v7 = vld [vmem:[%s3561_s28] sm:$0xff]  }
 0x811   :  { %974 = vadd.xlane.f32.xlu1 %v973_v32  ;;  %2984 = vmatpush3.bf16.msra.mxu0 %v3208_v7 }
 0x812   :  { %v976_v34 = vsel %vm292_vm8, %v970_v33, 0.0  ;;  %2985 = vmatprep.subr.bf16.mxu0 %v3318_v1 }
 0x815   :  { %977 = vadd.xlane.f32.xlu1 %v976_v34  ;;  %2986 = vmatpush3.bf16.msra.mxu0 %v3209_v44 }
 0x816   :  { %3003 = vmatprep.subr.bf16.mxu0 %v3318_v1 }
 0x89e   :  { %v975_v35 = vpop.xlane.xlu1 %974 }
 0x89f   :  { %v979_v36 = vmul.f32 0.03125, %v975_v35  ;;  %v2731_v35 = vld [vmem:[%s3608_s24] ss:$0 sm:$0xff] }
 0x8a1   :  { %v981_v37 = vsub.f32 %v969_v31, %v979_v36 }
 0x8a2   :  { %v978_v38 = vpop.xlane.xlu1 %977 }
 0x8a3   :  { %v980_v39 = vmul.f32 0.03125, %v978_v38  ;;  %v983_v40 = vmul.f32 %v981_v37, %v981_v37 }
 0x8a5   :  { %v982_v41 = vsub.f32 %v970_v33, %v980_v39  ;;  %v985_v42 = vsel %vm292_vm8, %v983_v40, 0.0 }
 0x8a6   :  { %986 = vadd.xlane.f32.xlu1 %v985_v42 }
 0x8a7   :  { %v984_v43 = vmul.f32 %v982_v41, %v982_v41 }
 0x8a9   :  { %v988_v6 = vsel %vm292_vm8, %v984_v43, 0.0 }
 0x8aa   :  { %989 = vadd.xlane.f32.xlu1 %v988_v6 }
 0x933   :  { %v987_v45 = vpop.xlane.xlu1 %986 }
 0x934   :  { %v991_v46 = vmul.f32 0.03125, %v987_v45 }
 0x936   :  { %v993_v48 = vadd.f32 1e-12, %v991_v46 }
 0x937   :  { %v990_v49 = vpop.xlane.xlu1 %989 }
 0x938   :  { %3252 = vrsqrt.f32 %v993_v48  ;;  %v992_v50 = vmul.f32 0.03125, %v990_v49 }
 0x93a   :  { %v994_v51 = vadd.f32 1e-12, %v992_v50 }
 0x93c   :  { %3254 = vrsqrt.f32 %v994_v51 }
 0x942   :  { %v3253_v52 = vpop.eup %3252 }
 0x943   :  { %v997_v53 = vmul.f32 %v3253_v52, %v981_v37 }
 0x945   :  { %v1005_v57 = vmul.f32 %v2725_v54, %v997_v53 }
 0x946   :  { %v3255_v55 = vpop.eup %3254 }
 0x947   :  { %v998_v58 = vmul.f32 %v3255_v55, %v982_v41  ;;  %v1013_v61 = vadd.f32 %v2726_v59, %v1005_v57  ;;  %v3214_v55 = vld [vmem:[%s3422_s26 + $0x10] sm:$0xff]   ;;  %v3215_v57 = vld [vmem:[%s3422_s26 + $0x18] sm:$0xff]   ;;  %s3342_s26 = smov 22  }
 0x948   :  { %s3627_s4 = sld [smem:[%s3876_s0 + %s3342_s26]]  }
 0x949   :  { %v1006_v60 = vmul.f32 %v2725_v54, %v998_v58 }
 0x94b   :  { %v1014_v62 = vadd.f32 %v2726_v59, %v1006_v60 }
 0x94d   :  { %v1015_v63 = vpack.c.bf16 %v1014_v62, %v1013_v61 }
 0x94f   :  { %2988 = vmatmul.mubr.msk.bf16.vlgmr.msra.gmra.mrb[16].mxu0 %vm292_vm8, %v1015_v63 }
 0x950   :  { %3007 = vmatprep.mubr.msk.bf16.mxu0 %vm3320_vm0, %v3318_v1  ;;  %3004 = vmatpush3.bf16.msra.mxu0 %v3214_v55 }
 0x951   :  { %3005 = vmatprep.subr.bf16.mxu0 %v3318_v1 }
 0x954   :  { %3006 = vmatpush3.bf16.msra.mxu0 %v3215_v57 }
 0x955   :  { %3011 = vmatprep.subr.bf16.mxu0 %v3318_v1 }
 0xa22   :  { %v1076_v8 = vpop.f32.mrb[16].mxu0 }
 0xa23   :  { %v1077_v24 = vadd.f32 %v2727_v5, %v1076_v8  ;;  %v2989_v9 = vpop.f32.mrb[17].mxu0 }
 0xa24   :  { %v1079_v10 = vpop.f32.mrb[18].mxu0 }
 0xa25   :  { %v1085_v11 = vmul.f32 0.044715, %v1077_v24  ;;  %v1080_v12 = vadd.f32 %v2727_v5, %v1079_v10  ;;  %v2990_v13 = vpop.f32.mrb[19].mxu0  ;;  %v1083_v29 = vmul.f32 0.5, %v1077_v24 }
 0xa26   :  { %v2744_v13 = vld [vmem:[%s3446_s8 + $0x1] ss:$0 sm:$0xff]  ;;  %s3343_s8 = smov 3  }
 0xa27   :  { %v1087_v14 = vmul.f32 %v1085_v11, %v1077_v24  ;;  %v1086_v15 = vmul.f32 0.044715, %v1080_v12  ;;  %v1084_v30 = vmul.f32 0.5, %v1080_v12 }
 0xa29   :  { %v1089_v16 = vmul.f32 %v1087_v14, %v1077_v24  ;;  %v1088_v17 = vmul.f32 %v1086_v15, %v1080_v12 }
 0xa2b   :  { %v1091_v19 = vadd.f32 %v1089_v16, %v1077_v24  ;;  %v1090_v20 = vmul.f32 %v1088_v17, %v1080_v12  ;;  %v2738_v24 = vld [vmem:[%s3627_s4] ss:$0 sm:$0xff] }
 0xa2d   :  { %v1093_v22 = vmul.f32 0.7978846, %v1091_v19  ;;  %v1092_v23 = vadd.f32 %v1090_v20, %v1080_v12 }
 0xa2f   :  { %3256 = vtanh.f32 %v1093_v22  ;;  %v1094_v25 = vmul.f32 0.7978846, %v1092_v23 }
 0xa31   :  { %3258 = vtanh.f32 %v1094_v25 }
 0xa39   :  { %v3257_v26 = vpop.eup %3256 }
 0xa3a   :  { %v1097_v27 = vadd.f32 1.0, %v3257_v26 }
 0xa3b   :  { %v3259_v28 = vpop.eup %3258 }
 0xa3c   :  { %v1098_v31 = vadd.f32 1.0, %v3259_v28  ;;  %v1099_v32 = vmul.f32 %v1097_v27, %v1083_v29 }
 0xa3e   :  { %v1100_v33 = vmul.f32 %v1098_v31, %v1084_v30 }
 0xa40   :  { %v1101_v34 = vpack.c.bf16 %v1100_v33, %v1099_v32 }
 0xa42   :  { %3000 = vmatmul.mubr.msk.bf16.vlgmr.msra.gmra.mrb[28].mxu1 %vm1141_vm13, %v1101_v34 }
 0xa43   :  { %3019 = vmatprep.mubr.msk.bf16.mxu1 %vm3320_vm0, %v3318_v1 }
 0xb15   :  { %v1179_v36 = vpop.f32.mrb[28].mxu1 }
 0xb16   :  { %v1180_v37 = vadd.f32 %v2731_v35, %v1179_v36  ;;  %v3001_v38 = vpop.f32.mrb[29].mxu1 }
 0xb17   :  { %v1182_v39 = vpop.f32.mrb[30].mxu1 }
 0xb18   :  { %v1183_v40 = vadd.f32 %v2731_v35, %v1182_v39  ;;  %v3002_v41 = vpop.f32.mrb[31].mxu1  ;;  %v1186_v42 = vadd.f32 %v1180_v37, %v1013_v61 }
 0xb1a   :  { %v1190_v43 = vsel %vm292_vm8, %v1186_v42, 0.0  ;;  %v1187_v6 = vadd.f32 %v1183_v40, %v1014_v62 }
 0xb1b   :  { %1191 = vadd.xlane.f32.xlu1 %v1190_v43 }
 0xb1c   :  { %v1193_v7 = vsel %vm292_vm8, %v1187_v6, 0.0 }
 0xb1f   :  { %1194 = vadd.xlane.f32.xlu1 %v1193_v7 }
 0xba8   :  { %v1192_v44 = vpop.xlane.xlu1 %1191 }
 0xba9   :  { %v1196_v45 = vmul.f32 0.03125, %v1192_v44 }
 0xbab   :  { %v1198_v46 = vsub.f32 %v1186_v42, %v1196_v45 }
 0xbac   :  { %v1195_v48 = vpop.xlane.xlu1 %1194 }
 0xbad   :  { %v1197_v49 = vmul.f32 0.03125, %v1195_v48  ;;  %v1200_v50 = vmul.f32 %v1198_v46, %v1198_v46 }
 0xbaf   :  { %v1199_v51 = vsub.f32 %v1187_v6, %v1197_v49  ;;  %v1202_v52 = vsel %vm292_vm8, %v1200_v50, 0.0 }
 0xbb0   :  { %1203 = vadd.xlane.f32.xlu0 %v1202_v52 }
 0xbb1   :  { %v1201_v53 = vmul.f32 %v1199_v51, %v1199_v51 }
 0xbb3   :  { %v1205_v54 = vsel %vm292_vm8, %v1201_v53, 0.0 }
 0xbb4   :  { %1206 = vadd.xlane.f32.xlu1 %v1205_v54 }
 0xc3d   :  { %v1204_v58 = vpop.xlane.xlu0 %1203 }
 0xc3e   :  { %v1208_v59 = vmul.f32 0.03125, %v1204_v58 }
 0xc40   :  { %v1210_v60 = vadd.f32 1e-12, %v1208_v59 }
 0xc41   :  { %v1207_v61 = vpop.xlane.xlu1 %1206 }
 0xc42   :  { %3260 = vrsqrt.f32 %v1210_v60  ;;  %v1209_v62 = vmul.f32 0.03125, %v1207_v61 }
 0xc44   :  { %v1211_v63 = vadd.f32 1e-12, %v1209_v62 }
 0xc46   :  { %3262 = vrsqrt.f32 %v1211_v63 }
 0xc4c   :  { %v3261_v0 = vpop.eup %3260 }
 0xc4d   :  { %v1214_v2 = vmul.f32 %v3261_v0, %v1198_v46 }
 0xc4f   :  { %v1222_v5 = vmul.f32 %v2737_v3, %v1214_v2 }
 0xc50   :  { %v3263_v4 = vpop.eup %3262 }
 0xc51   :  { %v1215_v8 = vmul.f32 %v3263_v4, %v1199_v51  ;;  %v3631_v10 = vadd.f32 %v2738_v24, %v1222_v5 }
 0xc53   :  { %v1223_v9 = vmul.f32 %v2737_v3, %v1215_v8 }
 0xc55   :  { %v3633_v11 = vadd.f32 %v2738_v24, %v1223_v9 }
 0xc57   :  { %v1232_v12 = vpack.c.bf16 %v3633_v11, %v3631_v10 }
 0xc59   :  { %3008 = vmatmul.mubr.msk.bf16.vlgmr.msra.gmra.mrb[20].mxu0 %vm292_vm8, %v1232_v12 }
 0xc5a   :  { %3013 = vmatprep.mubr.msk.bf16.mxu0 %vm3320_vm0, %v3318_v1 }
 0xd2c   :  { %v1295_v14 = vpop.f32.mrb[20].mxu0 }
 0xd2d   :  { %v3009_v15 = vpop.f32.mrb[21].mxu0  ;;  %v1296_v17 = vadd.f32 %v2744_v13, %v1295_v14 }
 0xd2e   :  { %v1298_v16 = vpop.f32.mrb[22].mxu0 }
 0xd2f   :  { %v1299_v19 = vadd.f32 %v2744_v13, %v1298_v16  ;;  %v3010_v20 = vpop.f32.mrb[23].mxu0  ;;  %v1310_v23 = vpack.c.bf16 %v1296_v17, %v1296_v17 }
 0xd31   :  { %v3181_v22 = vpack.i.bf16 %v1299_v19, %v1296_v17  ;;  %v1311_v25 = vpack.c.bf16 %v1299_v19, %v1299_v19 }
 0xd33   :  { %3182 = vrot.lane.b32.xlu1 %v3181_v22, %s3330_s10  ;;  %s3351_s10 = smov 26  }
 0xd37   :  { %1315 = vrot.lane.b32.xlu1 %v1310_v23, %s3329_s9 }
 0xd3b   :  { %1364 = vrot.lane.b32.xlu1 %v1311_v25, %s3329_s9 }
 0xda5   :  { %v3183_v26 = vpop.permute.xlu1 %3182 }
 0xda6   :  { %v3185_v27 = vunpack.i.h.bf16 %v3183_v26  ;;  %v3184_v28 = vunpack.i.l.bf16 %v3183_v26 }
 0xda8   :  { %v1313_v29 = vpack.c.bf16 %v3185_v27, %v3185_v27  ;;  %v1312_v30 = vpack.c.bf16 %v3184_v28, %v3184_v28 }
 0xda9   :  { %v1316_v31 = vpop.permute.xlu1 %1315 }
 0xdaa   :  { %v1321_v32 = vsel %vm455_vm9, %v1316_v31, 0  ;;  %1413 = vrot.lane.b32.xlu0 %v1312_v30, %s3329_s9  ;;  %1462 = vrot.lane.b32.xlu1 %v1313_v29, %s3329_s9  ;;  %s2686_s9 = sld [smem:[%s3876_s0 + %s3350_s3]]  }
 0xdab   :  { %3012 = vmatpush3.bf16.xpose.msra.mxu0 %v1321_v32 }
 0xdac   :  { %3023 = vmatprep.subr.bf16.mxu0 %v3318_v1 }
 0xdad   :  { %v1365_v33 = vpop.permute.xlu1 %1364 }
 0xdae   :  { %v1370_v34 = vsel %vm455_vm9, %v1365_v33, 0  ;;  %1538 = vrot.lane.b32.xlu1 %v1310_v23, %s3331_s11 }
 0xdaf   :  { %3018 = vmatpush3.bf16.xpose.msra.mxu1 %v1370_v34 }
 0xdb0   :  { %3029 = vmatprep.subr.bf16.mxu1 %v3318_v1 }
 0xdb2   :  { %3014 = vmatmul.mubr.msk.bf16.vlgmr.msra.gmra.mrb[24].mxu0 %vm455_vm9, %v1310_v23 }
 0xdb3   :  { %3025 = vmatprep.mubr.msk.bf16.mxu0 %vm3320_vm0, %v3318_v1 }
 0xdb6   :  { %3020 = vmatmul.mubr.msk.bf16.vlgmr.msra.gmra.mrb[32].mxu1 %vm455_vm9, %v1311_v25 }
 0xdb7   :  { %3031 = vmatprep.mubr.msk.bf16.mxu1 %vm3320_vm0, %v3318_v1 }
 0xe1c   :  { %v1414_v35 = vpop.permute.xlu0 %1413  ;;  %v1463_v36 = vpop.permute.xlu1 %1462 }
 0xe1d   :  { %v1419_v37 = vsel %vm455_vm9, %v1414_v35, 0  ;;  %v1468_v38 = vsel %vm455_vm9, %v1463_v36, 0  ;;  %v3216_v36 = vld [vmem:[%s3534_s18 + $0x10] sm:$0xff]  }
 0xe1e   :  { %3024 = vmatpush3.bf16.xpose.msra.mxu0 %v1419_v37  ;;  %3030 = vmatpush3.bf16.xpose.msra.mxu1 %v1468_v38 }
 0xe1f   :  { %3035 = vmatprep.subr.bf16.mxu0 %v3318_v1  ;;  %3041 = vmatprep.subr.bf16.mxu1 %v3318_v1 }
 0xe20   :  { %v1539_v39 = vpop.permute.xlu1 %1538 }
 0xe21   :  { %v1544_v40 = vsel %vm683_vm10, %v1539_v39, 0 }
 0xe25   :  { %3026 = vmatmul.mubr.msk.bf16.vlgmr.msra.gmra.mrb[28].mxu0 %vm455_vm9, %v1312_v30  ;;  %3032 = vmatmul.mubr.msk.bf16.vlgmr.msra.gmra.mrb[36].mxu1 %vm455_vm9, %v1313_v29 }
 0xe26   :  { %3036 = vmatpush3.bf16.msra.mxu0 %v1544_v40  ;;  %3037 = vmatprep.mubr.msk.bf16.mxu0 %vm3320_vm0, %v3318_v1 }
 0xe27   :  { %3047 = vmatprep.subr.bf16.mxu0 %v3318_v1  ;;  %3043 = vmatprep.mubr.msk.bf16.mxu1 %vm3320_vm0, %v3318_v1 }
 0xe85   :  { %v1357_v41 = vpop.f32.mrb[24].mxu0 }
 0xe86   :  { %v1358_v42 = vadd.f32 %v1357_v41, %v3494_v47  ;;  %v3015_v43 = vpop.f32.mrb[25].mxu0 }
 0xe87   :  { %v1360_v6 = vpop.f32.mrb[26].mxu0 }
 0xe88   :  { %v3016_v7 = vpop.f32.mrb[27].mxu0  ;;  %v1510_v44 = vsel %vm649_vm12, %v1358_v42, -inf }
 0xe89   :  { %1511 = vmax.xlane.f32.xlu1 %v1510_v44  ;;  %v1406_v45 = vpop.f32.mrb[32].mxu1 }
 0xe8a   :  { %v1407_v46 = vadd.f32 %v1406_v45, %v3499_v56  ;;  %v3021_v48 = vpop.f32.mrb[33].mxu1  ;;  %v3217_v45 = vld [vmem:[%s3534_s18 + $0x18] sm:$0xff]   ;;  %s3344_s18 = smov 23  }
 0xe8b   :  { %v1409_v49 = vpop.f32.mrb[34].mxu1 }
 0xe8c   :  { %v3022_v50 = vpop.f32.mrb[35].mxu1  ;;  %v1513_v51 = vsel %vm649_vm12, %v1407_v46, -inf }
 0xe8d   :  { %1514 = vmax.xlane.f32.xlu0 %v1513_v51 }
 0xe9a   :  { %1634 = vrot.lane.b32.xlu1 %v1312_v30, %s3331_s11 }
 0xea3   :  { %1586 = vrot.lane.b32.xlu0 %v1311_v25, %s3331_s11 }
 0xef8   :  { %v1455_v52 = vpop.f32.mrb[28].mxu0  ;;  %v1504_v53 = vpop.f32.mrb[36].mxu1 }
 0xef9   :  { %v1456_v54 = vadd.f32 %v1455_v52, %v3494_v47  ;;  %v3027_v55 = vpop.f32.mrb[29].mxu0  ;;  %v3033_v57 = vpop.f32.mrb[37].mxu1  ;;  %v1505_v60 = vadd.f32 %v1504_v53, %v3499_v56 }
 0xefa   :  { %v1458_v58 = vpop.f32.mrb[30].mxu0  ;;  %v1507_v59 = vpop.f32.mrb[38].mxu1 }
 0xefb   :  { %v3028_v61 = vpop.f32.mrb[31].mxu0  ;;  %v3034_v62 = vpop.f32.mrb[39].mxu1  ;;  %v1516_v63 = vsel %vm649_vm12, %v1456_v54, -inf  ;;  %v1519_v0 = vsel %vm649_vm12, %v1505_v60, -inf }
 0xefc   :  { %1517 = vmax.xlane.f32.xlu1 %v1516_v63 }
 0xf00   :  { %1520 = vmax.xlane.f32.xlu1 %v1519_v0 }
 0xf11   :  { %1682 = vrot.lane.b32.xlu1 %v1313_v29, %s3331_s11  ;;  %s3746_s11 = sld [smem:[%s3876_s0 + %s3343_s8]]   ;;  %s3357_s8 = smov 33  }
 0xf16   :  { %v1512_v2 = vpop.xlane.xlu1 %1511 }
 0xf17   :  { %v1522_v3 = vsub.f32 %v1358_v42, %v1512_v2 }
 0xf19   :  { %v1526_v4 = vmul.f32 1.442695, %v1522_v3 }
 0xf1a   :  { %v1515_v47 = vpop.xlane.xlu0 %1514  ;;  %v1635_v12 = vpop.permute.xlu1 %1634 }
 0xf1b   :  { %3264 = vpow2.f32 %v1526_v4  ;;  %v1523_v5 = vsub.f32 %v1407_v46, %v1515_v47  ;;  %v1640_v14 = vsel %vm683_vm10, %v1635_v12, 0 }
 0xf1d   :  { %v1528_v8 = vmul.f32 1.442695, %v1523_v5 }
 0xf1e   :  { %v1587_v24 = vpop.permute.xlu0 %1586 }
 0xf1f   :  { %3266 = vpow2.f32 %v1528_v8  ;;  %v1592_v56 = vsel %vm683_vm10, %v1587_v24, 0 }
 0xf20   :  { %3042 = vmatpush3.bf16.msra.mxu1 %v1592_v56 }
 0xf21   :  { %3053 = vmatprep.subr.bf16.mxu1 %v3318_v1 }
 0xf25   :  { %v3265_v9 = vpop.eup %3264 }
 0xf26   :  { %v1534_v13 = vpack.c.bf16 %v3265_v9, %v3265_v9  ;;  %v1730_v34 = vsel %vm649_vm12, %v3265_v9, 0.0  ;;  %v2761_v9 = vld [vmem:[%s3549_s23 + $0x1] ss:$0 sm:$0xff]  ;;  %s2687_s23 = sld [smem:[%s3876_s0 + %s3351_s10]]  }
 0xf28   :  { %3038 = vmatmul.mubr.msk.bf16.vlgmr.msra.gmra.mrb[32].mxu0 %vm649_vm12, %v1534_v13 }
 0xf29   :  { %v3267_v15 = vpop.eup %3266  ;;  %3048 = vmatpush3.bf16.msra.mxu0 %v1640_v14  ;;  %3049 = vmatprep.mubr.msk.bf16.mxu0 %vm3320_vm0, %v3318_v1 }
 0xf2a   :  { %v1535_v16 = vpack.c.bf16 %v3267_v15, %v3267_v15  ;;  %3059 = vmatprep.subr.bf16.mxu0 %v3318_v1  ;;  %v1733_v35 = vsel %vm649_vm12, %v3267_v15, 0.0 }
 0xf2c   :  { %3044 = vmatmul.mubr.msk.bf16.vlgmr.msra.gmra.mrb[40].mxu1 %vm649_vm12, %v1535_v16 }
 0xf2d   :  { %3055 = vmatprep.mubr.msk.bf16.mxu1 %vm3320_vm0, %v3318_v1 }
 0xf89   :  { %v1518_v17 = vpop.xlane.xlu1 %1517 }
 0xf8a   :  { %v1524_v19 = vsub.f32 %v1456_v54, %v1518_v17 }
 0xf8c   :  { %v1530_v20 = vmul.f32 1.442695, %v1524_v19 }
 0xf8d   :  { %v1521_v22 = vpop.xlane.xlu1 %1520 }
 0xf8e   :  { %3268 = vpow2.f32 %v1530_v20  ;;  %v1525_v23 = vsub.f32 %v1505_v60, %v1521_v22 }
 0xf90   :  { %v1532_v25 = vmul.f32 1.442695, %v1525_v23 }
 0xf91   :  { %v1683_v26 = vpop.permute.xlu1 %1682 }
 0xf92   :  { %3270 = vpow2.f32 %v1532_v25  ;;  %v1688_v27 = vsel %vm683_vm10, %v1683_v26, 0  ;;  %vm2595_vm10 = vcmask 1024  }
 0xf93   :  { %3054 = vmatpush3.bf16.msra.mxu1 %v1688_v27 }
 0xf94   :  { %3067 = vmatprep.subr.bf16.mxu1 %v3318_v1 }
 0xf98   :  { %v3269_v28 = vpop.eup %3268 }
 0xf99   :  { %v1736_v29 = vsel %vm649_vm12, %v3269_v28, 0.0  ;;  %v1536_v30 = vpack.c.bf16 %v3269_v28, %v3269_v28 }
 0xf9a   :  { %1737 = vadd.xlane.f32.xlu1 %v1736_v29 }
 0xf9b   :  { %3050 = vmatmul.mubr.msk.bf16.vlgmr.msra.gmra.mrb[36].mxu0 %vm649_vm12, %v1536_v30 }
 0xf9c   :  { %v3271_v31 = vpop.eup %3270  ;;  %3063 = vmatprep.mubr.msk.bf16.mxu0 %vm3320_vm0, %v3318_v1  ;;  %3060 = vmatpush3.bf16.msra.mxu0 %v3216_v36 }
 0xf9d   :  { %v1739_v32 = vsel %vm649_vm12, %v3271_v31, 0.0  ;;  %v1537_v33 = vpack.c.bf16 %v3271_v31, %v3271_v31  ;;  %3061 = vmatprep.subr.bf16.mxu0 %v3318_v1 }
 0xf9e   :  { %1740 = vadd.xlane.f32.xlu0 %v1739_v32 }
 0xf9f   :  { %3056 = vmatmul.mubr.msk.bf16.vlgmr.msra.gmra.mrb[44].mxu1 %vm649_vm12, %v1537_v33 }
 0xfa0   :  { %3071 = vmatprep.mubr.msk.bf16.mxu1 %vm3320_vm0, %v3318_v1  ;;  %3062 = vmatpush3.bf16.msra.mxu0 %v3217_v45  ;;  %v2768_v45 = vld [vmem:[%s3576_s5 + $0x1] ss:$0 sm:$0xff] }
 0xfa1   :  { %3075 = vmatprep.subr.bf16.mxu0 %v3318_v1 }
 0xfa2   :  { %1731 = vadd.xlane.f32.xlu0 %v1730_v34  ;;  %v3219_v34 = vld [vmem:[%s3561_s28 + $0x18] sm:$0xff]  }
 0xfa6   :  { %1734 = vadd.xlane.f32.xlu0 %v1733_v35 }
 0xffb   :  { %v1580_v37 = vpop.f32.mrb[32].mxu0 }
 0xffc   :  { %v3039_v38 = vpop.f32.mrb[33].mxu0 }
 0xffd   :  { %v1583_v39 = vpop.f32.mrb[34].mxu0 }
 0xffe   :  { %v3040_v40 = vpop.f32.mrb[35].mxu0 }
 0xfff   :  { %v1628_v41 = vpop.f32.mrb[40].mxu1 }
0x1000   :  { %v3045_v42 = vpop.f32.mrb[41].mxu1 }
0x1001   :  { %v1631_v43 = vpop.f32.mrb[42].mxu1 }
0x1002   :  { %v3046_v6 = vpop.f32.mrb[43].mxu1  ;;  %v2767_v43 = vld [vmem:[%s3570_s2 + $0x1] ss:$0 sm:$0xff]  ;;  %s3345_s2 = smov 29  }
0x1003   :  { %s2690_s7 = sld [smem:[%s3876_s0 + %s3345_s2]]  }
0x1027   :  { %v1738_v7 = vpop.xlane.xlu1 %1737 }
0x1028   :  { %3272 = vrcp.f32 %v1738_v7 }
0x102b   :  { %v1741_v44 = vpop.xlane.xlu0 %1740 }
0x102c   :  { %3274 = vrcp.f32 %v1741_v44 }
0x102f   :  { %v1732_v61 = vpop.xlane.xlu0 %1731 }
0x1030   :  { %3276 = vrcp.f32 %v1732_v61 }
0x1032   :  { %v3273_v50 = vpop.eup %3272 }
0x1033   :  { %v1735_v62 = vpop.xlane.xlu0 %1734 }
0x1034   :  { %3278 = vrcp.f32 %v1735_v62 }
0x1036   :  { %v3275_v52 = vpop.eup %3274 }
0x103a   :  { %v3277_v63 = vpop.eup %3276 }
0x103b   :  { %v1746_v3 = vmul.f32 %v3277_v63, %v1580_v37 }
0x103e   :  { %v3279_v0 = vpop.eup %3278 }
0x103f   :  { %v1747_v4 = vmul.f32 %v3279_v0, %v1628_v41 }
0x106e   :  { %v1676_v46 = vpop.f32.mrb[36].mxu0 }
0x106f   :  { %v3051_v48 = vpop.f32.mrb[37].mxu0  ;;  %v1748_v54 = vmul.f32 %v3273_v50, %v1676_v46 }
0x1070   :  { %v1679_v49 = vpop.f32.mrb[38].mxu0 }
0x1071   :  { %v3052_v51 = vpop.f32.mrb[39].mxu0 }
0x1072   :  { %v1724_v53 = vpop.f32.mrb[44].mxu1  ;;  %v3220_v51 = vld [vmem:[%s3586_s13 + $0x20] sm:$0xff]  }
0x1073   :  { %v1749_v55 = vmul.f32 %v3275_v52, %v1724_v53  ;;  %v3057_v57 = vpop.f32.mrb[45].mxu1  ;;  %v3221_v52 = vld [vmem:[%s3586_s13 + $0x28] sm:$0xff]   ;;  %v3222_v53 = vld [vmem:[%s3586_s13 + $0x30] sm:$0xff]  }
0x1074   :  { %v1727_v58 = vpop.f32.mrb[46].mxu1 }
0x1075   :  { %v3186_v59 = vpack.i.bf16 %v1749_v55, %v1748_v54  ;;  %v3058_v60 = vpop.f32.mrb[47].mxu1  ;;  %v3223_v54 = vld [vmem:[%s3586_s13 + $0x38] sm:$0xff]   ;;  %v2774_v55 = vld [vmem:[%s3599_s17 + $0x1] ss:$0 sm:$0xff] }
0x1077   :  { %3187 = vrot.lane.b32.xlu1 %v3186_v59, %s3334_s19 }
0x10e9   :  { %v3188_v2 = vpop.permute.xlu1 %3187 }
0x10ea   :  { %v3190_v47 = vunpack.i.h.bf16 %v3188_v2  ;;  %v3189_v5 = vunpack.i.l.bf16 %v3188_v2 }
0x10ec   :  { %v1759_v8 = vsel %vm455_vm9, %v1747_v4, %v3190_v47  ;;  %v1758_v24 = vsel %vm455_vm9, %v1746_v3, %v3189_v5 }
0x10ed   :  { %v1760_v56 = vpack.c.bf16 %v1759_v8, %v1758_v24 }
0x10ef   :  { %3064 = vmatmul.mubr.msk.bf16.vlgmr.msra.gmra.mrb[40].mxu0 %vm292_vm8, %v1760_v56 }
0x10f0   :  { %3083 = vmatprep.mubr.msk.bf16.mxu0 %vm3320_vm0, %v3318_v1  ;;  %3076 = vmatpush3.bf16.msra.mxu0 %v3220_v51 }
0x10f1   :  { %3077 = vmatprep.subr.bf16.mxu0 %v3318_v1 }
0x10f4   :  { %3078 = vmatpush3.bf16.msra.mxu0 %v3221_v52 }
0x10f5   :  { %3079 = vmatprep.subr.bf16.mxu0 %v3318_v1 }
0x10f8   :  { %3080 = vmatpush3.bf16.msra.mxu0 %v3222_v53  ;;  %v2795_v53 = vld [vmem:[%s3622_s30 + $0x1] ss:$0 sm:$0xff] }
0x10f9   :  { %3081 = vmatprep.subr.bf16.mxu0 %v3318_v1 }
0x10fc   :  { %3082 = vmatpush3.bf16.msra.mxu0 %v3223_v54 }
0x10fd   :  { %3103 = vmatprep.subr.bf16.mxu0 %v3318_v1 }
0x11c2   :  { %v1823_v12 = vpop.f32.mrb[40].mxu0 }
0x11c3   :  { %v1824_v13 = vadd.f32 %v2761_v9, %v1823_v12  ;;  %v3065_v14 = vpop.f32.mrb[41].mxu0 }
0x11c4   :  { %v1826_v15 = vpop.f32.mrb[42].mxu0 }
0x11c5   :  { %v1827_v16 = vadd.f32 %v2761_v9, %v1826_v15  ;;  %v3066_v17 = vpop.f32.mrb[43].mxu0  ;;  %v1830_v19 = vadd.f32 %v1824_v13, %v3631_v10 }
0x11c7   :  { %v1836_v20 = vsel %vm292_vm8, %v1830_v19, 0.0  ;;  %v1831_v22 = vadd.f32 %v1827_v16, %v3633_v11  ;;  %v3218_v11 = vld [vmem:[%s3561_s28 + $0x10] sm:$0xff]   ;;  %s2684_s28 = sld [smem:[%s3876_s0 + %s3344_s18]]  }
0x11c8   :  { %1837 = vadd.xlane.f32.xlu0 %v1836_v20  ;;  %3068 = vmatpush3.bf16.msra.mxu1 %v3218_v11  ;;  %s2694_s18 = sld [smem:[%s3876_s0 + %s3357_s8]]  }
0x11c9   :  { %v1839_v23 = vsel %vm292_vm8, %v1831_v22, 0.0  ;;  %3069 = vmatprep.subr.bf16.mxu1 %v3318_v1 }
0x11cc   :  { %1840 = vadd.xlane.f32.xlu0 %v1839_v23  ;;  %3070 = vmatpush3.bf16.msra.mxu1 %v3219_v34 }
0x11cd   :  { %3087 = vmatprep.subr.bf16.mxu1 %v3318_v1 }
0x1255   :  { %v1838_v25 = vpop.xlane.xlu0 %1837 }
0x1256   :  { %v1842_v26 = vmul.f32 0.03125, %v1838_v25 }
0x1258   :  { %v1844_v27 = vsub.f32 %v1830_v19, %v1842_v26 }
0x1259   :  { %v1841_v28 = vpop.xlane.xlu0 %1840 }
0x125a   :  { %v1843_v29 = vmul.f32 0.03125, %v1841_v28  ;;  %v1846_v30 = vmul.f32 %v1844_v27, %v1844_v27 }
0x125c   :  { %v1845_v31 = vsub.f32 %v1831_v22, %v1843_v29  ;;  %v1848_v32 = vsel %vm292_vm8, %v1846_v30, 0.0  ;;  %v2787_v22 = vld [vmem:[%s3608_s24 + $0x1] ss:$0 sm:$0xff]  ;;  %s2665_s24 = sld [smem:[%s3876_s0 + %s3355_s20]]  }
0x125d   :  { %1849 = vadd.xlane.f32.xlu0 %v1848_v32 }
0x125e   :  { %v1847_v10 = vmul.f32 %v1845_v31, %v1845_v31 }
0x1260   :  { %v1851_v33 = vsel %vm292_vm8, %v1847_v10, 0.0 }
0x1261   :  { %1852 = vadd.xlane.f32.xlu0 %v1851_v33  ;;  %v3749_v33 = vld [vmem:[%s3746_s11] sm:$0xff] }
0x12ea   :  { %v1850_v35 = vpop.xlane.xlu0 %1849 }
0x12eb   :  { %v1854_v36 = vmul.f32 0.03125, %v1850_v35 }
0x12ed   :  { %v1856_v37 = vadd.f32 1e-12, %v1854_v36 }
0x12ee   :  { %v1853_v38 = vpop.xlane.xlu0 %1852 }
0x12ef   :  { %3280 = vrsqrt.f32 %v1856_v37  ;;  %v1855_v39 = vmul.f32 0.03125, %v1853_v38 }
0x12f1   :  { %v1857_v40 = vadd.f32 1e-12, %v1855_v39 }
0x12f3   :  { %3282 = vrsqrt.f32 %v1857_v40 }
0x12f9   :  { %v3281_v41 = vpop.eup %3280 }
0x12fa   :  { %v1860_v42 = vmul.f32 %v3281_v41, %v1844_v27 }
0x12fc   :  { %v1868_v7 = vmul.f32 %v2767_v43, %v1860_v42 }
0x12fd   :  { %v3283_v6 = vpop.eup %3282 }
0x12fe   :  { %v1861_v44 = vmul.f32 %v3283_v6, %v1845_v31  ;;  %v1876_v48 = vadd.f32 %v2768_v45, %v1868_v7  ;;  %v3225_v6 = vld [vmem:[%s2684_s28 + $0x8] sm:$0xff]   ;;  %v3226_v7 = vld [vmem:[%s2690_s7] sm:$0xff]  }
0x1300   :  { %v1869_v46 = vmul.f32 %v2767_v43, %v1861_v44  ;;  %v3224_v43 = vld [vmem:[%s2684_s28] sm:$0xff]   ;;  %v3227_v44 = vld [vmem:[%s2690_s7 + $0x8] sm:$0xff]   ;;  %s3352_s28 = smov 28   ;;  %s3353_s7 = smov 32  }
0x1301   :  { %s2689_s6 = sld [smem:[%s3876_s0 + %s3352_s28]]  }
0x1302   :  { %v1877_v49 = vadd.f32 %v2768_v45, %v1869_v46  ;;  %s2693_s14 = sld [smem:[%s3876_s0 + %s3353_s7]]  }
0x1304   :  { %v1878_v50 = vpack.c.bf16 %v1877_v49, %v1876_v48 }
0x1306   :  { %3072 = vmatmul.mubr.msk.bf16.vlgmr.msra.gmra.mrb[48].mxu1 %vm292_vm8, %v1878_v50 }
0x1307   :  { %3091 = vmatprep.mubr.msk.bf16.mxu1 %vm3320_vm0, %v3318_v1  ;;  %3088 = vmatpush3.bf16.msra.mxu1 %v3224_v43 }
0x1308   :  { %3089 = vmatprep.subr.bf16.mxu1 %v3318_v1 }
0x130b   :  { %3090 = vmatpush3.bf16.msra.mxu1 %v3225_v6 }
0x130c   :  { %3095 = vmatprep.subr.bf16.mxu1 %v3318_v1 }
0x13d9   :  { %v1941_v57 = vpop.f32.mrb[48].mxu1 }
0x13da   :  { %v1942_v58 = vadd.f32 %v2774_v55, %v1941_v57  ;;  %v3073_v59 = vpop.f32.mrb[49].mxu1 }
0x13db   :  { %v1944_v60 = vpop.f32.mrb[50].mxu1 }
0x13dc   :  { %v1950_v61 = vmul.f32 0.044715, %v1942_v58  ;;  %v1945_v62 = vadd.f32 %v2774_v55, %v1944_v60  ;;  %v3074_v63 = vpop.f32.mrb[51].mxu1  ;;  %v1948_v14 = vmul.f32 0.5, %v1942_v58 }
0x13de   :  { %v1952_v0 = vmul.f32 %v1950_v61, %v1942_v58  ;;  %v1951_v2 = vmul.f32 0.044715, %v1945_v62  ;;  %v1949_v15 = vmul.f32 0.5, %v1945_v62 }
0x13e0   :  { %v1954_v3 = vmul.f32 %v1952_v0, %v1942_v58  ;;  %v1953_v4 = vmul.f32 %v1951_v2, %v1945_v62 }
0x13e2   :  { %v1956_v47 = vadd.f32 %v1954_v3, %v1942_v58  ;;  %v1955_v5 = vmul.f32 %v1953_v4, %v1945_v62  ;;  %v2796_v58 = vld [vmem:[%s3627_s4 + $0x1] ss:$0 sm:$0xff] }
0x13e4   :  { %v1958_v8 = vmul.f32 0.7978846, %v1956_v47  ;;  %v1957_v24 = vadd.f32 %v1955_v5, %v1945_v62 }
0x13e6   :  { %3284 = vtanh.f32 %v1958_v8  ;;  %v1959_v56 = vmul.f32 0.7978846, %v1957_v24  ;;  %v2797_v24 = vld [vmem:[%s2685_s15] ss:$0 sm:$0xff] }
0x13e8   :  { %3286 = vtanh.f32 %v1959_v56 }
0x13f0   :  { %v3285_v9 = vpop.eup %3284 }
0x13f1   :  { %v1962_v12 = vadd.f32 1.0, %v3285_v9 }
0x13f2   :  { %v3287_v13 = vpop.eup %3286 }
0x13f3   :  { %v1963_v16 = vadd.f32 1.0, %v3287_v13  ;;  %v1964_v17 = vmul.f32 %v1962_v12, %v1948_v14 }
0x13f5   :  { %v1965_v19 = vmul.f32 %v1963_v16, %v1949_v15 }
0x13f7   :  { %v1966_v20 = vpack.c.bf16 %v1965_v19, %v1964_v17 }
0x13f9   :  { %3084 = vmatmul.mubr.msk.bf16.vlgmr.msra.gmra.mrb[44].mxu0 %vm1141_vm13, %v1966_v20 }
0x13fa   :  { %3107 = vmatprep.mubr.msk.bf16.mxu0 %vm3320_vm0, %v3318_v1  ;;  %3104 = vmatpush3.bf16.msra.mxu0 %v3226_v7 }
0x13fb   :  { %3105 = vmatprep.subr.bf16.mxu0 %v3318_v1 }
0x13fe   :  { %3106 = vmatpush3.bf16.msra.mxu0 %v3227_v44 }
0x14cc   :  { %v2045_v23 = vpop.f32.mrb[44].mxu0 }
0x14cd   :  { %v2046_v25 = vadd.f32 %v2787_v22, %v2045_v23  ;;  %v3085_v26 = vpop.f32.mrb[45].mxu0 }
0x14ce   :  { %v2048_v27 = vpop.f32.mrb[46].mxu0 }
0x14cf   :  { %v2049_v28 = vadd.f32 %v2787_v22, %v2048_v27  ;;  %v3086_v29 = vpop.f32.mrb[47].mxu0  ;;  %v2052_v30 = vadd.f32 %v2046_v25, %v1876_v48 }
0x14d1   :  { %v2058_v31 = vsel %vm292_vm8, %v2052_v30, 0.0  ;;  %v2053_v32 = vadd.f32 %v2049_v28, %v1877_v49 }
0x14d2   :  { %2059 = vadd.xlane.f32.xlu1 %v2058_v31 }
0x14d3   :  { %v2061_v10 = vsel %vm292_vm8, %v2053_v32, 0.0 }
0x14d4   :  { %2062 = vadd.xlane.f32.xlu0 %v2061_v10 }
0x14e3   :  { %2361 = vperm.xlu1 %3170, %v3749_v33  }
0x155f   :  { %v2060_v11 = vpop.xlane.xlu1 %2059 }
0x1560   :  { %v2064_v34 = vmul.f32 0.03125, %v2060_v11 }
0x1561   :  { %v2063_v35 = vpop.xlane.xlu0 %2062 }
0x1562   :  { %v2066_v36 = vsub.f32 %v2052_v30, %v2064_v34  ;;  %v2065_v37 = vmul.f32 0.03125, %v2063_v35 }
0x1564   :  { %v2067_v38 = vsub.f32 %v2053_v32, %v2065_v37  ;;  %v2068_v39 = vmul.f32 %v2066_v36, %v2066_v36 }
0x1566   :  { %v2070_v40 = vsel %vm292_vm8, %v2068_v39, 0.0  ;;  %v2069_v41 = vmul.f32 %v2067_v38, %v2067_v38 }
0x1567   :  { %2071 = vadd.xlane.f32.xlu0 %v2070_v40 }
0x1568   :  { %v2073_v42 = vsel %vm292_vm8, %v2069_v41, 0.0 }
0x156b   :  { %2074 = vadd.xlane.f32.xlu0 %v2073_v42 }
0x15f4   :  { %v2072_v45 = vpop.xlane.xlu0 %2071 }
0x15f5   :  { %v2076_v46 = vmul.f32 0.03125, %v2072_v45 }
0x15f7   :  { %v2078_v48 = vadd.f32 1e-12, %v2076_v46 }
0x15f8   :  { %v2075_v49 = vpop.xlane.xlu0 %2074 }
0x15f9   :  { %3288 = vrsqrt.f32 %v2078_v48  ;;  %v2077_v50 = vmul.f32 0.03125, %v2075_v49 }
0x15fb   :  { %v2079_v51 = vadd.f32 1e-12, %v2077_v50 }
0x15fd   :  { %3290 = vrsqrt.f32 %v2079_v51  ;;  %v3228_v51 = vld [vmem:[%s2688_s21] sm:$0xff]  }
0x1603   :  { %v3289_v52 = vpop.eup %3288 }
0x1604   :  { %v2082_v54 = vmul.f32 %v3289_v52, %v2066_v36  ;;  %v3229_v52 = vld [vmem:[%s2688_s21 + $0x8] sm:$0xff]  }
0x1606   :  { %v2090_v55 = vmul.f32 %v2795_v53, %v2082_v54 }
0x1607   :  { %v3291_v57 = vpop.eup %3290 }
0x1608   :  { %v2083_v59 = vmul.f32 %v3291_v57, %v2067_v38  ;;  %v2098_v61 = vadd.f32 %v2796_v58, %v2090_v55 }
0x160a   :  { %v2091_v60 = vmul.f32 %v2795_v53, %v2083_v59  ;;  %v2408_v0 = vpack.c.bf16 %v2098_v61, %v2098_v61 }
0x160c   :  { %v2099_v62 = vadd.f32 %v2796_v58, %v2091_v60  ;;  %v2423_v4 = vunpack.c.l.b16 %v2408_v0  ;;  %v2809_v60 = vld [vmem:[%s2691_s1] ss:$0 sm:$0xff] }
0x160d   :  { %v2801_v0 = vld [vmem:[%s2686_s9] ss:$0 sm:$0xff] }
0x160e   :  { %v2100_v63 = vpack.c.bf16 %v2099_v62, %v2098_v61  ;;  %v2409_v2 = vpack.c.bf16 %v2099_v62, %v2099_v62 }
0x1610   :  { %3092 = vmatmul.mubr.msk.bf16.vlgmr.msra.gmra.mrb[52].mxu1 %vm292_vm8, %v2100_v63  ;;  %v2424_v3 = vunpack.c.l.b16 %v2409_v2 }
0x1611   :  { %3099 = vmatprep.mubr.msk.bf16.mxu1 %vm3320_vm0, %v3318_v1  ;;  %3096 = vmatpush3.bf16.msra.mxu1 %v3228_v51 }
0x1612   :  { %v2425_v47 = vrot.slane %v2424_v3, 7  ;;  %3097 = vmatprep.subr.bf16.mxu1 %v3318_v1 }
0x1614   :  { %v2427_v5 = vsel %vm2426_vm14, %v2425_v47, %v2423_v4  ;;  %v2802_v47 = vld [vmem:[%s2687_s23] ss:$0 sm:$0xff] }
0x1615   :  { %v2428_v8 = vpack.c.b16 %v2427_v5, %v2427_v5  ;;  %3098 = vmatpush3.bf16.msra.mxu1 %v3229_v52 }
0x1616   :  { %3111 = vmatprep.subr.bf16.mxu1 %v3318_v1 }
0x1617   :  { %3108 = vmatmul.mubr.msk.bf16.vlgmr.msra.gmra.mrb[48].mxu0 %vm292_vm8, %v2428_v8 }
0x16e3   :  { %v2161_v56 = vpop.f32.mrb[52].mxu1 }
0x16e4   :  { %v2162_v9 = vadd.f32 %v2797_v24, %v2161_v56  ;;  %v3093_v12 = vpop.f32.mrb[53].mxu1  ;;  %v3230_v56 = vld [vmem:[%s3785_s27] sm:$0xff]  }
0x16e5   :  { %v2164_v13 = vpop.f32.mrb[54].mxu1  ;;  %v3231_v12 = vld [vmem:[%s3785_s27 + $0x8] sm:$0xff]  }
0x16e6   :  { %v2170_v14 = vmul.f32 0.044715, %v2162_v9  ;;  %v2165_v15 = vadd.f32 %v2797_v24, %v2164_v13  ;;  %v3094_v16 = vpop.f32.mrb[55].mxu1  ;;  %v2168_v11 = vmul.f32 0.5, %v2162_v9 }
0x16e8   :  { %v2171_v17 = vmul.f32 0.044715, %v2165_v15  ;;  %v2172_v19 = vmul.f32 %v2170_v14, %v2162_v9  ;;  %v2169_v37 = vmul.f32 0.5, %v2165_v15 }
0x16ea   :  { %v3772_v20 = vpop.f32.mrb[48].mxu0  ;;  %v2174_v22 = vmul.f32 %v2172_v19, %v2162_v9  ;;  %v2173_v23 = vmul.f32 %v2171_v17, %v2165_v15 }
0x16eb   :  { %v3109_v25 = vpop.f32.mrb[49].mxu0  ;;  %v2479_v63 = vadd.f32 %v2809_v60, %v3772_v20 }
0x16ec   :  { %v2481_v26 = vpop.f32.mrb[50].mxu0  ;;  %v2176_v27 = vadd.f32 %v2174_v22, %v2162_v9  ;;  %v2175_v28 = vmul.f32 %v2173_v23, %v2165_v15  ;;  %v2813_v25 = vld [vmem:[%s2693_s14] ss:$0 sm:$0xff] }
0x16ed   :  { %v3110_v29 = vpop.f32.mrb[51].mxu0 }
0x16ee   :  { %v2178_v30 = vmul.f32 0.7978846, %v2176_v27  ;;  %v2177_v31 = vadd.f32 %v2175_v28, %v2165_v15  ;;  %v2803_v15 = vld [vmem:[%s2689_s6] ss:$0 sm:$0xff] }
0x16f0   :  { %3292 = vtanh.f32 %v2178_v30  ;;  %v2179_v32 = vmul.f32 0.7978846, %v2177_v31 }
0x16f2   :  { %3294 = vtanh.f32 %v2179_v32  ;;  %v3816_v32 = vld [vmem:[%s3746_s11 + $0x8] sm:$0xff]  ;;  %s3354_s11 = smov 5  }
0x16f3   :  { %s2666_s17 = sld [smem:[%s3876_s0 + %s3354_s11]]  }
0x16fa   :  { %v3293_v10 = vpop.eup %3292 }
0x16fb   :  { %v2182_v34 = vadd.f32 1.0, %v3293_v10 }
0x16fc   :  { %v3295_v35 = vpop.eup %3294 }
0x16fd   :  { %v2184_v36 = vmul.f32 %v2182_v34, %v2168_v11  ;;  %v2183_v38 = vadd.f32 1.0, %v3295_v35 }
0x16ff   :  { %v2188_v39 = vsel %vm292_vm8, %v2184_v36, 0.0  ;;  %v2185_v40 = vmul.f32 %v2183_v38, %v2169_v37  ;;  %v2362_v38 = vpop.permute.xlu1 %2361 }
0x1700   :  { %2189 = vadd.xlane.f32.xlu0 %v2188_v39  ;;  %vm2366_vm1 = vcmp.eq.s32.totalorder %v3396_v18, %v2362_v38 }
0x1701   :  { %v2191_v41 = vsel %vm292_vm8, %v2185_v40, 0.0 }
0x1704   :  { %2192 = vadd.xlane.f32.xlu0 %v2191_v41 }
0x178d   :  { %v2190_v42 = vpop.xlane.xlu0 %2189 }
0x178e   :  { %v2194_v43 = vmul.f32 0.03125, %v2190_v42 }
0x1790   :  { %v2196_v6 = vsub.f32 %v2184_v36, %v2194_v43 }
0x1791   :  { %v2193_v7 = vpop.xlane.xlu0 %2192 }
0x1792   :  { %v2195_v44 = vmul.f32 0.03125, %v2193_v7  ;;  %v2198_v45 = vmul.f32 %v2196_v6, %v2196_v6 }
0x1794   :  { %v2197_v46 = vsub.f32 %v2185_v40, %v2195_v44  ;;  %v2200_v48 = vsel %vm292_vm8, %v2198_v45, 0.0 }
0x1795   :  { %2201 = vadd.xlane.f32.xlu0 %v2200_v48 }
0x1796   :  { %v2199_v49 = vmul.f32 %v2197_v46, %v2197_v46 }
0x1798   :  { %v2203_v50 = vsel %vm292_vm8, %v2199_v49, 0.0 }
0x1799   :  { %2204 = vadd.xlane.f32.xlu0 %v2203_v50 }
0x1822   :  { %v2202_v53 = vpop.xlane.xlu0 %2201 }
0x1823   :  { %v2206_v54 = vmul.f32 0.03125, %v2202_v53  ;;  %v3843_v53 = vld [vmem:[%s2666_s17] sm:$0x3] }
0x1825   :  { %v2208_v55 = vadd.f32 1e-12, %v2206_v54 }
0x1826   :  { %v2205_v57 = vpop.xlane.xlu0 %2204 }
0x1827   :  { %3296 = vrsqrt.f32 %v2208_v55  ;;  %v2207_v58 = vmul.f32 0.03125, %v2205_v57 }
0x1829   :  { %v2209_v59 = vadd.f32 1e-12, %v2207_v58 }
0x182b   :  { %3298 = vrsqrt.f32 %v2209_v59 }
0x182c   :  { %3300 = vtanh.f32 %v2479_v63 }
0x1831   :  { %v3297_v61 = vpop.eup %3296 }
0x1832   :  { %v2212_v62 = vmul.f32 %v3297_v61, %v2196_v6 }
0x1834   :  { %v2220_v3 = vmul.f32 %v2801_v0, %v2212_v62 }
0x1835   :  { %v3299_v2 = vpop.eup %3298 }
0x1836   :  { %v2213_v4 = vmul.f32 %v3299_v2, %v2197_v46  ;;  %v2228_v8 = vadd.f32 %v2802_v47, %v2220_v3  ;;  %v3301_v13 = vpop.eup %3300 }
0x1837   :  { %v2485_v14 = vpack.c.bf16 %v3301_v13, %v3301_v13 }
0x1838   :  { %v2221_v5 = vmul.f32 %v2801_v0, %v2213_v4 }
0x183a   :  { %v2229_v24 = vadd.f32 %v2802_v47, %v2221_v5 }
0x183c   :  { %v2230_v9 = vpack.c.bf16 %v2229_v24, %v2228_v8 }
0x183e   :  { %3100 = vmatmul.mubr.msk.bf16.vlgmr.msra.gmra.mrb[56].mxu1 %vm292_vm8, %v2230_v9  ;;  %v2300_v9 = vld [vmem:[%s2665_s24] sm:$0xff] }
0x183f   :  { %3112 = vmatpush3.bf16.msra.mxu1 %v3230_v56  ;;  %3115 = vmatprep.mubr.msk.bf16.mxu1 %vm3320_vm0, %v3318_v1 }
0x1840   :  { %3113 = vmatprep.subr.bf16.mxu1 %v3318_v1 }
0x1843   :  { %3114 = vmatpush3.bf16.msra.mxu1 %v3231_v12 }
0x1846   :  { %3116 = vmatmul.mubr.msk.bf16.vlgmr.msra.gmra.mrb[60].mxu1 %vm292_vm8, %v2485_v14  ;;  %v2301_v14 = vld [vmem:[%s2665_s24 + $0x8] sm:$0xff] }
0x1911   :  { %v2291_v16 = vpop.f32.mrb[56].mxu1 }
0x1912   :  { %v2292_v17 = vadd.f32 %v2803_v15, %v2291_v16  ;;  %v3101_v19 = vpop.f32.mrb[57].mxu1 }
0x1913   :  { %v2294_v20 = vpop.f32.mrb[58].mxu1 }
0x1914   :  { %2302 = vmax.xlane.f32.xlu0 %v2292_v17  ;;  %v3102_v22 = vpop.f32.mrb[59].mxu1  ;;  %v2295_v23 = vadd.f32 %v2803_v15, %v2294_v20  ;;  %v2368_v7 = vsel %vm2366_vm1, %v2292_v17, 0.0  ;;  %vm2644_vm1 = vcmask 1041408  }
0x1918   :  { %2304 = vmax.xlane.f32.xlu0 %v2295_v23 }
0x1919   :  { %v2546_v26 = vpop.f32.mrb[60].mxu1 }
0x191a   :  { %v3811_v27 = vadd.f32 %v2813_v25, %v2546_v26  ;;  %v3117_v28 = vpop.f32.mrb[61].mxu1  ;;  %v2392_v25 = vsel %vm2378_vm6, %v2301_v14, 0.0 }
0x191b   :  { %v2549_v29 = vpop.f32.mrb[62].mxu1 }
0x191c   :  { %v3118_v30 = vpop.f32.mrb[63].mxu1  ;;  %v2554_v31 = vsel %vm2553_vm15, %v3811_v27, -inf }
0x191d   :  { %2555 = vmax.xlane.f32.xlu1 %v2554_v31 }
0x192e   :  { %2364 = vperm.xlu0 %3169, %v3816_v32  }
0x19a1   :  { %v2303_v10 = vpop.xlane.xlu0 %2302 }
0x19a2   :  { %v2344_v11 = vsub.f32 %v2292_v17, %v2303_v10  ;;  %vm2306_vm0 = vcmp.eq.f32.partialorder %v2292_v17, %v2303_v10 }
0x19a3   :  { %v3828_v44 = vsel %vm2306_vm0, %v3396_v18, 128 }
0x19a4   :  { %v2346_v34 = vmul.f32 1.442695, %v2344_v11  ;;  %v2311_v45 = vshra.s32 %v3828_v44, 16  ;;  %v2310_v28 = vand.u32 65535, %v3828_v44 }
0x19a5   :  { %v3819_v35 = vpop.xlane.xlu0 %2304 }
0x19a6   :  { %3302 = vpow2.f32 %v2346_v34  ;;  %v2345_v36 = vsub.f32 %v2295_v23, %v3819_v35  ;;  %vm2307_vm2 = vcmp.eq.f32.partialorder %v2295_v23, %v3819_v35  ;;  %v2313_v49 = vcvt.s32.f32 %v2311_v45 }
0x19a7   :  { %v3834_v48 = vsel %vm2307_vm2, %v3396_v18, 128  ;;  %v2312_v30 = vcvt.s32.f32 %v2310_v28  ;;  %vm2652_vm2 = vcmp.eq.s32.totalorder %v3396_v18, 0 }
0x19a8   :  { %v2348_v37 = vmul.f32 1.442695, %v2345_v36  ;;  %v2325_v50 = vshra.s32 %v3834_v48, 16  ;;  %v2324_v31 = vand.u32 65535, %v3834_v48 }
0x19aa   :  { %3304 = vpow2.f32 %v2348_v37  ;;  %v3822_v40 = vpop.xlane.xlu1 %2555  ;;  %v2327_v52 = vcvt.s32.f32 %v2325_v50  ;;  %v2326_v34 = vcvt.s32.f32 %v2324_v31 }
0x19ab   :  { %v2577_v41 = vsub.f32 %v3811_v27, %v3822_v40  ;;  %vm2557_vm4 = vcmp.eq.f32.partialorder %v3811_v27, %v3822_v40 }
0x19ac   :  { %v2558_v51 = vsel %vm2557_vm4, %v3396_v18, 2 }
0x19ad   :  { %v2365_v43 = vpop.permute.xlu0 %2364  ;;  %v2578_v6 = vmul.f32 1.442695, %v2577_v41  ;;  %v2559_v54 = vsel %vm2553_vm15, %v2558_v51, 2147483647 }
0x19ae   :  { %vm2367_vm3 = vcmp.eq.s32.totalorder %v3396_v18, %v2365_v43  ;;  %v2561_v57 = vshra.s32 %v2559_v54, 16 }
0x19af   :  { %3306 = vpow2.f32 %v2578_v6  ;;  %v2369_v46 = vsel %vm2367_vm3, %v2295_v23, 0.0  ;;  %v2391_v23 = vsel %vm2378_vm6, %v2300_v9, 0.0 }
0x19b0   :  { %v3303_v39 = vpop.eup %3302  ;;  %v2563_v59 = vcvt.s32.f32 %v2561_v57 }
0x19b1   :  { %2350 = vadd.xlane.f32.xlu0 %v3303_v39 }
0x19b4   :  { %v3305_v42 = vpop.eup %3304 }
0x19b5   :  { %2352 = vadd.xlane.f32.xlu1 %v3305_v42 }
0x19b9   :  { %2370 = vadd.xlane.f32.xlu1 %v2368_v7  ;;  %v3307_v55 = vpop.eup %3306 }
0x19ba   :  { %v2580_v58 = vsel %vm2553_vm15, %v3307_v55, 0.0 }
0x19bd   :  { %2372 = vadd.xlane.f32.xlu1 %v2369_v46 }
0x19c1   :  { %2314 = vmin.xlane.f32.xlu1 %v2313_v49 }
0x19c5   :  { %2328 = vmin.xlane.f32.xlu1 %v2327_v52 }
0x19c7   :  { %2587 = vperm.xlu0 %3169, %v3843_v53  }
0x19c9   :  { %2581 = vadd.xlane.f32.xlu1 %v2580_v58 }
0x19cd   :  { %2564 = vmin.xlane.f32.xlu1 %v2563_v59 }
0x1a3e   :  { %v2351_v60 = vpop.xlane.xlu0 %2350 }
0x1a3f   :  { %3308 = vlog2.f32 %v2351_v60 }
0x1a42   :  { %v2353_v61 = vpop.xlane.xlu1 %2352 }
0x1a43   :  { %3310 = vlog2.f32 %v2353_v61 }
0x1a46   :  { %v2588_v62 = vpop.permute.xlu0 %2587  ;;  %v2371_v63 = vpop.xlane.xlu1 %2370 }
0x1a47   :  { %vm2589_vm5 = vcmp.eq.s32.totalorder %v3396_v18, %v2588_v62 }
0x1a48   :  { %v2590_v0 = vsel %vm2589_vm5, %v3811_v27, 0.0  ;;  %v2393_v27 = vadd.f32 %v2392_v25, %v2391_v23 }
0x1a49   :  { %v3309_v2 = vpop.eup %3308  ;;  %v2591_v3 = vsel %vm2553_vm15, %v2590_v0, 0.0 }
0x1a4a   :  { %v2355_v4 = vmul.f32 0.6931472, %v3309_v2  ;;  %2592 = vadd.xlane.f32.xlu0 %v2591_v3  ;;  %v2373_v47 = vpop.xlane.xlu1 %2372 }
0x1a4c   :  { %v2358_v5 = vadd.f32 %v2355_v4, %v2303_v10 }
0x1a4d   :  { %v3311_v8 = vpop.eup %3310 }
0x1a4e   :  { %v2357_v24 = vmul.f32 0.6931472, %v3311_v8  ;;  %v2374_v56 = vsub.f32 %v2358_v5, %v2371_v63  ;;  %v2315_v13 = vpop.xlane.xlu1 %2314 }
0x1a4f   :  { %vm2316_vm7 = vcmp.eq.f32.partialorder %v2313_v49, %v2315_v13  ;;  %v2321_v48 = vcvt.f32.s32 %v2315_v13 }
0x1a50   :  { %v2359_v12 = vadd.f32 %v2357_v24, %v3819_v35  ;;  %v2376_v15 = vmul.f32 %v2374_v56, %v2300_v9  ;;  %v2317_v10 = vsel %vm2316_vm7, %v2312_v30, inf  ;;  %v2560_v35 = vand.u32 65535, %v2559_v54 }
0x1a51   :  { %v2322_v55 = vshll.u32 %v2321_v48, 16 }
0x1a52   :  { %v2375_v16 = vsub.f32 %v2359_v12, %v2373_v47  ;;  %v2329_v19 = vpop.xlane.xlu1 %2328  ;;  %v2379_v20 = vsel %vm2378_vm6, %v2376_v15, 0.0  ;;  %v2562_v37 = vcvt.s32.f32 %v2560_v35 }
0x1a53   :  { %vm2330_vm8 = vcmp.eq.f32.partialorder %v2327_v52, %v2329_v19  ;;  %v2335_v58 = vcvt.f32.s32 %v2329_v19 }
0x1a54   :  { %v2377_v17 = vmul.f32 %v2375_v16, %v2301_v14  ;;  %v2331_v36 = vsel %vm2330_vm8, %v2326_v34, inf }
0x1a55   :  { %v2336_v2 = vshll.u32 %v2335_v58, 16 }
0x1a56   :  { %v2380_v22 = vsel %vm2378_vm6, %v2377_v17, 0.0  ;;  %v2582_v29 = vpop.xlane.xlu1 %2581 }
0x1a57   :  { %v2381_v26 = vadd.f32 %v2380_v22, %v2379_v20  ;;  %3312 = vlog2.f32 %v2582_v29 }
0x1a59   :  { %2382 = vadd.xlane.f32.xlu1 %v2381_v26 }
0x1a5a   :  { %v2565_v11 = vpop.xlane.xlu1 %2564 }
0x1a5b   :  { %vm2566_vm9 = vcmp.eq.f32.partialorder %v2563_v59, %v2565_v11  ;;  %v2571_v3 = vcvt.f32.s32 %v2565_v11 }
0x1a5c   :  { %v2567_v38 = vsel %vm2566_vm9, %v2562_v37, inf }
0x1a5d   :  { %2394 = vadd.xlane.f32.xlu1 %v2393_v27  ;;  %v2572_v56 = vshll.u32 %v2571_v3, 16 }
0x1a61   :  { %2318 = vmin.xlane.f32.xlu1 %v2317_v10  ;;  %v3313_v39 = vpop.eup %3312 }
0x1a62   :  { %v2584_v41 = vmul.f32 0.6931472, %v3313_v39 }
0x1a64   :  { %v2585_v42 = vadd.f32 %v2584_v41, %v3822_v40 }
0x1a65   :  { %2332 = vmin.xlane.f32.xlu1 %v2331_v36 }
0x1a69   :  { %2568 = vmin.xlane.f32.xlu1 %v2567_v38 }
0x1ad7   :  { %v2593_v43 = vpop.xlane.xlu0 %2592 }
0x1ad8   :  { %v2594_v6 = vsub.f32 %v2585_v42, %v2593_v43 }
0x1ada   :  { %v2596_v7 = vsel %vm2595_vm10, %v2594_v6, 0.0 }
0x1adb   :  { %2597 = vadd.xlane.f32.xlu1 %v2596_v7 }
0x1ae6   :  { %v2383_v44 = vpop.xlane.xlu1 %2382 }
0x1ae7   :  { %v2384_v45 = vrot.slane %v2383_v44, 4 }
0x1ae9   :  { %v2385_v46 = vadd.f32 %v2384_v45, %v2383_v44 }
0x1aea   :  { %v2395_v49 = vpop.xlane.xlu1 %2394 }
0x1aeb   :  { %v2386_v50 = vrot.slane %v2385_v46, 2  ;;  %v2396_v51 = vrot.slane %v2395_v49, 4 }
0x1aed   :  { %v2397_v52 = vadd.f32 %v2396_v51, %v2395_v49  ;;  %v2387_v54 = vadd.f32 %v2386_v50, %v2385_v46 }
0x1aee   :  { %v2319_v57 = vpop.xlane.xlu1 %2318 }
0x1aef   :  { %v2398_v59 = vrot.slane %v2397_v52, 2  ;;  %v2320_v60 = vcvt.f32.s32 %v2319_v57  ;;  %v2388_v40 = vrot.slane %v2387_v54, 1 }
0x1af1   :  { %v2323_v61 = vadd.s32 %v2322_v55, %v2320_v60  ;;  %v2389_v62 = vadd.f32 %v2388_v40, %v2387_v54  ;;  %v2399_v63 = vadd.f32 %v2398_v59, %v2397_v52 }
0x1af2   :  { %v2333_v0 = vpop.xlane.xlu1 %2332 }
0x1af3   :  { %v2334_v4 = vcvt.f32.s32 %v2333_v0  ;;  %3119 = vpush %v2389_v62  ;;  %v2400_v47 = vrot.slane %v2399_v63, 1  ;;  %vm2338_vm11 = vcmp.eq.s32.totalorder %v2323_v61, %v3749_v33 }
0x1af4   :  { %v2807_v12 = vsel %vm2338_vm11, 1.0, %v3318_v1 }
0x1af5   :  { %v2337_v5 = vadd.s32 %v2336_v2, %v2334_v4  ;;  %v2401_v8 = vadd.f32 %v2400_v47, %v2399_v63 }
0x1af6   :  { %v2569_v24 = vpop.xlane.xlu1 %2568 }
0x1af7   :  { %vm2339_vm12 = vcmp.eq.s32.totalorder %v2337_v5, %v3816_v32  ;;  %v2570_v9 = vcvt.f32.s32 %v2569_v24  ;;  %3121 = vpush %v2401_v8 }
0x1af8   :  { %v2808_v13 = vsel %vm2339_vm12, 1.0, %v3318_v1 }
0x1af9   :  { %v2573_v14 = vadd.s32 %v2572_v56, %v2570_v9  ;;  %v3191_v15 = vpack.i.bf16 %v2808_v13, %v2807_v12 }
0x1afb   :  { %3192 = vperm.xlu1 %3170, %v3191_v15   ;;  %vm2574_vm13 = vcmp.eq.s32.totalorder %v2573_v14, %v3843_v53  ;;  %v2613_v53 = vadd.s32 1, %v3405_v21 }
0x1afc   :  { %v2817_v16 = vsel %vm2574_vm13, 1.0, %v3318_v1  ;;  %v2612_v1 = vadd.s32 8, %v3405_v21 }
0x1afd   :  { %2640 = vperm.xlu0 %3169, %v2817_v16   ;;  %v2636_v31 = vadd.s32 16, %v2613_v53  ;;  %vm2615_vm14 = vcmp.eq.s32.totalorder %v3396_v18, %v2613_v53 }
0x1afe   :  { %v2614_v27 = vadd.s32 1, %v2612_v1 }
0x1aff   :  { %vm2637_vm0 = vcmp.eq.s32.totalorder %v3396_v18, %v2636_v31 }
0x1b00   :  { %vm2616_vm15 = vcmp.eq.s32.totalorder %v3396_v18, %v2614_v27 }
0x1b24   :  { %s3864_s25 = spop %3119 }
0x1b28   :  { %s3122_s27 = spop %3121 }
0x1b29   :  { %s2403_s30 = smax.f32 %s3356_s29, %s3122_s27 }
0x1b2a   :  { %v2404_v33 = vstv %s2403_s30 }
0x1b2b   :  { %3314 = vrcp.f32 %v2404_v33 }
0x1b35   :  { %v3315_v32 = vpop.eup %3314 }
0x1b36   :  { %3123 = vpush %v3315_v32 }
0x1b67   :  { %s3124_s26 = spop %3123 }
0x1b68   :  { %v2598_v17 = vpop.xlane.xlu1 %2597  ;;  %s2407_s1 = smul.f32 %s3124_s26, %s3864_s25 }
0x1b69   :  { %v2599_v19 = vrot.slane %v2598_v17, 4 }
0x1b6b   :  { %v2600_v20 = vadd.f32 %v2599_v19, %v2598_v17 }
0x1b6d   :  { %v2601_v22 = vrot.slane %v2600_v20, 2 }
0x1b6f   :  { %v2602_v23 = vadd.f32 %v2601_v22, %v2600_v20 }
0x1b71   :  { %v2603_v25 = vrot.slane %v2602_v23, 1 }
0x1b73   :  { %v2604_v26 = vadd.f32 %v2603_v25, %v2602_v23 }
0x1b75   :  { %3125 = vpush %v2604_v26 }
0x1b7a   :  { %v3193_v28 = vpop.permute.xlu1 %3192 }
0x1b7b   :  { %v3195_v29 = vunpack.i.h.bf16 %v3193_v28  ;;  %v3194_v30 = vunpack.i.l.bf16 %v3193_v28 }
0x1b7c   :  { %v2641_v34 = vpop.permute.xlu0 %2640 }
0x1b7d   :  { %v2628_v10 = vsel %vm2616_vm15, %v3195_v29, 0.0  ;;  %v2627_v11 = vsel %vm2615_vm14, %v3194_v30, 0.0  ;;  %v2643_v36 = vsel %vm2637_vm0, %v2641_v34, 0.0 }
0x1b7e   :  { %v2629_v35 = vadd.f32 %v2628_v10, %v2627_v11  ;;  %v2645_v37 = vsel %vm2644_vm1, %v2643_v36, 0.0 }
0x1b7f   :  { %v2646_v38 = vrot.slane %v2645_v37, 4 }
0x1b80   :  { %v2630_v21 = vrot.slane %v2629_v35, 4 }
0x1b81   :  { %v2647_v41 = vadd.f32 %v2646_v38, %v2645_v37 }
0x1b82   :  { %v2631_v39 = vadd.f32 %v2630_v21, %v2629_v35 }
0x1b83   :  { %v2648_v43 = vrot.slane %v2647_v41, 2 }
0x1b84   :  { %v2632_v42 = vrot.slane %v2631_v39, 2 }
0x1b85   :  { %v2649_v7 = vadd.f32 %v2648_v43, %v2647_v41 }
0x1b86   :  { %v2633_v6 = vadd.f32 %v2632_v42, %v2631_v39 }
0x1b87   :  { %v2650_v45 = vrot.slane %v2649_v7, 1 }
0x1b88   :  { %v2634_v44 = vrot.slane %v2633_v6, 1 }
0x1b89   :  { %v2651_v50 = vadd.f32 %v2650_v45, %v2649_v7 }
0x1b8a   :  { %v2635_v46 = vadd.f32 %v2634_v44, %v2633_v6 }
0x1ba6   :  { %s3126_s3 = spop %3125 }
0x1ba7   :  { %s2608_s4 = smul.f32 0.5, %s3126_s3 }
0x1ba9   :  { %s2609_s19 = sadd.f32 %s2608_s4, %s2407_s1 }
0x1bab   :  { %v2653_v48 = vstv %s2609_s19 }
0x1bac   :  { %v2654_v49 = vsel %vm2652_vm2, %v2653_v48, 0.0 }
0x1bad   :  { %v2655_v51 = vadd.f32 %v2654_v49, %v2635_v46 }
0x1baf   :  { %v2656_v52 = vadd.f32 %v2655_v51, %v2651_v50 }
0x1bb1   :  { %2657 = vst [vmem:[%s2694_s18] sm:$0x1] %v2656_v52 }

</bundles_post_ra>
